<compile_context>
chip_gen: v7x
topology: tpu7x:2x2x1
jax: 0.10.0
libtpu: 0.0.40
codegen_flags: <defaults>
</compile_context>

<pallas_src>
import functools

import jax
import jax.numpy as jnp
from jax.experimental import pallas as pl
from jax.experimental.pallas import tpu as pltpu

ACT_SLOPE = 0.1   # LeakyReLU slope used throughout NEBRN


# --------------------------------------------------------------- kernel helpers

def _leaky(a):
    return jnp.where(a >= 0.0, a, a * ACT_SLOPE)


def _pad_rows(M, W, K):
    """Geometry of the in-VMEM zero-padded, row-flattened image.

    Rows are flattened as r = h*W + w.  Vertical padding is handled by PAD
    zero rows above/below; horizontal out-of-range taps are masked.  TOP is
    PAD rounded up to 8 so the interior store is sublane-aligned.
    """
    p = K // 2
    pad = p * (W + 1)
    top = ((pad + 7) // 8) * 8
    return pad, top, top + M + pad


def _col_masks(M, W, K):
    """Per-row validity masks for horizontal tap offsets dx != 0."""
    p = K // 2
    col = jax.lax.broadcasted_iota(jnp.int32, (M, 1), 0) % W
    return {dx: (col + dx >= 0) & (col + dx < W)
            for dx in range(-p, p + 1) if dx != 0}


def _conv_from_padded(pad_ref, w_ref, *, M, W, K, base, masks):
    """Sum of K*K shifted (M, Cin) x (Cin, Cout) dots, f32 accumulation."""
    p = K // 2
    acc = None
    for ky in range(K):
        for kx in range(K):
            start = base + ky * W + kx
            xs = pad_ref[start:start + M, :]
            dx = kx - p
            if dx != 0:
                xs = jnp.where(masks[dx], xs, jnp.zeros_like(xs))
            part = jnp.dot(xs, w_ref[ky * K + kx],
                           preferred_element_type=jnp.float32)
            acc = part if acc is None else acc + part
    return acc


# -------------------------------------------------------------- Pallas kernels

def _conv_kernel(*refs, M, W, K, act, has_res):
    """Single conv (K=1 or K=3) + bias [+ LeakyReLU] [+ residual]."""
    if K == 1:
        if has_res:
            x_ref, w_ref, b_ref, r_ref, o_ref = refs
        else:
            x_ref, w_ref, b_ref, o_ref = refs
            r_ref = None
        acc = jnp.dot(x_ref[...], w_ref[0], preferred_element_type=jnp.float32)
    else:
        if has_res:
            x_ref, w_ref, b_ref, r_ref, o_ref, pad_ref = refs
        else:
            x_ref, w_ref, b_ref, o_ref, pad_ref = refs
            r_ref = None
        pad, top, _ = _pad_rows(M, W, K)
        masks = _col_masks(M, W, K)
        pad_ref[...] = jnp.zeros_like(pad_ref)
        pad_ref[top:top + M, :] = x_ref[...]
        acc = _conv_from_padded(pad_ref, w_ref, M=M, W=W, K=K,
                                base=top - pad, masks=masks)
    acc = acc + b_ref[...]
    if act:
        acc = _leaky(acc)
    if has_res:
        acc = acc + r_ref[...].astype(jnp.float32)
    o_ref[...] = acc.astype(o_ref.dtype)


def _resblock_kernel(x_ref, w1_ref, b1_ref, w2_ref, b2_ref, o_ref,
                     pad1_ref, pad2_ref, *, M, W, K):
    """Fused ResBlock: conv -> LeakyReLU -> conv -> + x, intermediate in VMEM."""
    pad, top, _ = _pad_rows(M, W, K)
    masks = _col_masks(M, W, K)
    x = x_ref[...]

    pad1_ref[...] = jnp.zeros_like(pad1_ref)
    pad1_ref[top:top + M, :] = x
    a = _conv_from_padded(pad1_ref, w1_ref, M=M, W=W, K=K,
                          base=top - pad, masks=masks) + b1_ref[...]
    a = _leaky(a)

    pad2_ref[...] = jnp.zeros_like(pad2_ref)
    pad2_ref[top:top + M, :] = a.astype(pad2_ref.dtype)
    a = _conv_from_padded(pad2_ref, w2_ref, M=M, W=W, K=K,
                          base=top - pad, masks=masks) + b2_ref[...]
    a = a + x.astype(jnp.float32)
    o_ref[...] = a.astype(o_ref.dtype)


# ------------------------------------------------------------------ wrappers

def conv2d(x, w, b, *, act=False, residual=None, out_dtype=None):
    """Stride-1 'same' conv (PyTorch default_conv).  x: (N,H,W,Cin) bf16,
    w: (K*K, Cin, Cout) bf16, b: (Cout,) f32.  Optional fused LeakyReLU /
    residual add.  Patch extraction happens inside the kernel (no im2col)."""
    N, H, W, Cin = x.shape
    KK, wcin, Cout = w.shape
    assert wcin == Cin
    K = {1: 1, 9: 3}[KK]
    M = H * W
    assert M % 8 == 0, "H*W must be a multiple of 8 for the row-tile layout"

    x2 = x.reshape(N * M, Cin)
    args = [x2, w, b.reshape(1, Cout).astype(jnp.float32)]
    in_specs = [
        pl.BlockSpec((M, Cin), lambda i: (i, 0)),
        pl.BlockSpec((KK, Cin, Cout), lambda i: (0, 0, 0)),
        pl.BlockSpec((1, Cout), lambda i: (0, 0)),
    ]
    has_res = residual is not None
    if has_res:
        args.append(residual.reshape(N * M, Cout))
        in_specs.append(pl.BlockSpec((M, Cout), lambda i: (i, 0)))

    scratch = []
    if K > 1:
        scratch = [pltpu.VMEM((_pad_rows(M, W, K)[2], Cin), x.dtype)]

    if out_dtype is None:
        out_dtype = x.dtype
    kernel = functools.partial(_conv_kernel, M=M, W=W, K=K, act=act,
                               has_res=has_res)
    out = pl.pallas_call(
        kernel,
        out_shape=jax.ShapeDtypeStruct((N * M, Cout), out_dtype),
        grid_spec=pltpu.PrefetchScalarGridSpec(
            num_scalar_prefetch=0,
            grid=(N,),
            in_specs=in_specs,
            out_specs=pl.BlockSpec((M, Cout), lambda i: (i, 0)),
            scratch_shapes=scratch,
        ),
        compiler_params=pltpu.CompilerParams(
            dimension_semantics=("parallel",)),
    )(*args)
    return out.reshape(N, H, W, Cout)


def resblock(x, rp):
    """Fused ResBlock: one pallas_call for conv+LeakyReLU+conv+skip."""
    (w1, b1), (w2, b2) = rp
    N, H, W, C = x.shape
    KK = w1.shape[0]
    K = {1: 1, 9: 3}[KK]
    M = H * W
    assert M % 8 == 0
    rows = _pad_rows(M, W, K)[2]

    kernel = functools.partial(_resblock_kernel, M=M, W=W, K=K)
    out = pl.pallas_call(
        kernel,
        out_shape=jax.ShapeDtypeStruct((N * M, C), x.dtype),
        grid_spec=pltpu.PrefetchScalarGridSpec(
            num_scalar_prefetch=0,
            grid=(N,),
            in_specs=[
                pl.BlockSpec((M, C), lambda i: (i, 0)),
                pl.BlockSpec((KK, C, C), lambda i: (0, 0, 0)),
                pl.BlockSpec((1, C), lambda i: (0, 0)),
                pl.BlockSpec((KK, C, C), lambda i: (0, 0, 0)),
                pl.BlockSpec((1, C), lambda i: (0, 0)),
            ],
            out_specs=pl.BlockSpec((M, C), lambda i: (i, 0)),
            scratch_shapes=[pltpu.VMEM((rows, C), x.dtype),
                            pltpu.VMEM((rows, C), x.dtype)],
        ),
        compiler_params=pltpu.CompilerParams(
            dimension_semantics=("parallel",)),
    )(x.reshape(N * M, C), w1, b1.reshape(1, C).astype(jnp.float32),
      w2, b2.reshape(1, C).astype(jnp.float32))
    return out.reshape(N, H, W, C)


# ------------------------------------------------------------ layout-only glue

def pixel_shuffle(x, r):
    """nn.PixelShuffle(r): channel c_in = c*r*r + i*r + j -> (h*r+i, w*r+j, c)."""
    N, H, W, C = x.shape
    Co = C // (r * r)
    x = x.reshape(N, H, W, Co, r, r)
    x = x.transpose(0, 1, 4, 2, 5, 3)
    return x.reshape(N, H * r, W * r, Co)


def space_to_depth(x, bs):
    """SpaceToDepth from the module: out channel index = (i*bs + j)*C + c."""
    N, H, W, C = x.shape
    x = x.reshape(N, H // bs, bs, W // bs, bs, C)
    x = x.transpose(0, 1, 3, 2, 4, 5)
    return x.reshape(N, H // bs, W // bs, bs * bs * C)


# ------------------------------------------------------------------ parameters

def conv_params(key, K, Cin, Cout, scale=0.02):
    kw, kb = jax.random.split(key)
    w = (scale * jax.random.normal(kw, (K, K, Cin, Cout), jnp.float32))
    w = w.astype(jnp.bfloat16).reshape(K * K, Cin, Cout)
    b = scale * jax.random.normal(kb, (Cout,), jnp.float32)
    return w, b


def init_nebrn(key, n_feats=64, num_blocks=10, scale=2, rgb_range=255.0):
    rgb_mean = jnp.array([0.4488, 0.4371, 0.4040], jnp.float32)
    rgb_std = jnp.array([1.0, 1.0, 1.0], jnp.float32)
    params = {
        # MeanShift = diagonal 1x1 conv -> plain per-channel affine.
        'sub_mean': (1.0 / rgb_std, -rgb_range * rgb_mean / rgb_std),
        'add_mean': (1.0 / rgb_std, rgb_range * rgb_mean / rgb_std),
    }
    keys = jax.random.split(key, 2 + num_blocks)

    wh, bh = conv_params(keys[0], 3, 3, n_feats)
    wh = jnp.pad(wh, ((0, 0), (0, 8 - 3), (0, 0)))        # pad Cin 3 -> 8 (zeros)
    params['head'] = (wh, bh)

    wt, bt = conv_params(keys[1], 3, n_feats * num_blocks, 3)
    wt = jnp.pad(wt, ((0, 0), (0, 0), (0, 128 - 3)))       # pad Cout 3 -> 128
    bt = jnp.pad(bt, (0, 128 - 3))                          # (lane-dense stores)
    params['tail'] = (wt, bt)

    blocks = []
    for bi in range(num_blocks):
        ki = iter(jax.random.split(keys[2 + bi], 25))
        blk = {
            'conv_head': conv_params(next(ki), 1, n_feats * scale * scale, n_feats),
            'res_head': [(conv_params(next(ki), 3, n_feats, n_feats),
                          conv_params(next(ki), 3, n_feats, n_feats))
                         for _ in range(5)],
            'mid': conv_params(next(ki), 3, n_feats, n_feats),
            'up': conv_params(next(ki), 1, n_feats, n_feats * scale * scale),
            'res_tail': [(conv_params(next(ki), 3, n_feats, n_feats),
                          conv_params(next(ki), 3, n_feats, n_feats))
                         for _ in range(5)],
            'conv_tail': conv_params(next(ki), 3, n_feats, n_feats),
        }
        blocks.append(blk)
    params['blocks'] = blocks
    return params


# ------------------------------------------------------------------ forward

def up_block(x, p, scale=2):
    o1 = conv2d(x, *p['conv_head'])                     # 1x1, 4*nf -> nf
    o2 = o1
    for rp in p['res_head']:
        o2 = resblock(o2, rp)                           # fused ResBlock
    o3_plus_o1 = conv2d(o2, *p['mid'], residual=o1)     # mid(o2) + o1 (fused)
    sr = pixel_shuffle(conv2d(o3_plus_o1, *p['up']), scale)
    o3 = sr
    for rp in p['res_tail']:
        o3 = resblock(o3, rp)
    return conv2d(o3, *p['conv_tail'], residual=sr)     # conv_tail(o3) + sr (fused)


def nebrn_forward(params, x, scale=2):
    sub_s, sub_b = params['sub_mean']
    h = x * sub_s + sub_b                               # MeanShift(-1), elementwise
    cin_pad = params['head'][0].shape[1]
    h = jnp.pad(h, ((0, 0), (0, 0), (0, 0), (0, cin_pad - 3)))
    h = h.astype(jnp.bfloat16)
    h = conv2d(h, *params['head'])                      # 3x3, 8 -> 64

    origin = jnp.concatenate([h] * (scale * scale), axis=-1)
    res = origin
    outs = []
    nb = len(params['blocks'])
    for bi, blk in enumerate(params['blocks']):
        o = up_block(res, blk, scale=scale)
        outs.append(o)
        if bi < nb - 1:
            res = res - space_to_depth(o, scale)

    y = conv2d(jnp.concatenate(outs, axis=-1), *params['tail'],
               out_dtype=jnp.float32)                   # Cout padded to 128
    y = y[..., :3]
    add_s, add_b = params['add_mean']
    return y * add_s + add_b                            # MeanShift(+1), elementwise


# --------------------------------------------------------------------------- main

if __name__ == "__main__":
    # ---- small self-checks of the fused conv kernels vs. XLA references ----
    ck = jax.random.split(jax.random.PRNGKey(42), 4)
    xt = jax.random.normal(ck[0], (2, 8, 8, 64), jnp.float32).astype(jnp.bfloat16)
    wc, bc = conv_params(ck[1], 3, 64, 64)
    ref = jax.lax.conv_general_dilated(
        xt.astype(jnp.float32), wc.reshape(3, 3, 64, 64).astype(jnp.float32),
        (1, 1), "SAME", dimension_numbers=("NHWC", "HWIO", "NHWC")) + bc
    got = conv2d(xt, wc, bc, out_dtype=jnp.float32)
    assert jnp.allclose(got, ref, atol=2e-2, rtol=2e-2), \
        float(jnp.max(jnp.abs(got - ref)))

    rb1 = conv_params(ck[2], 3, 64, 64)
    rb2 = conv_params(ck[3], 3, 64, 64)
    fused = resblock(xt, (rb1, rb2)).astype(jnp.float32)
    comp = conv2d(conv2d(xt, *rb1, act=True), *rb2,
                  residual=xt).astype(jnp.float32)
    assert jnp.allclose(fused, comp, atol=5e-2, rtol=5e-2)

    # ---- full NEBRN forward ----
    key = jax.random.PRNGKey(0)
    pkey, xkey = jax.random.split(key)
    params = init_nebrn(pkey, n_feats=64, num_blocks=10, scale=2)
    # LR input, batch=2, 8x8 spatial, 3 channels (NHWC), values in [0, 255].
    x = jax.random.uniform(xkey, (2, 8, 8, 3), jnp.float32, 0.0, 255.0)

    fwd = jax.jit(nebrn_forward)
    y = jax.block_until_ready(fwd(params, x))

    assert y.shape == (2, 16, 16, 3), y.shape           # (N, H*scale, W*scale, 3)
    assert bool(jnp.all(jnp.isfinite(y)))
    print("KERNEL_OK")
</pallas_src>

<mosaic_0001>
module attributes {stable_mosaic.version = 11 : i64} {
  func.func @_conv_kernel(%arg0: i32, %arg1: memref<64x64xbf16, #tpu.memory_space<vmem>>, %arg2: memref<9x64x64xbf16, #tpu.memory_space<vmem>>, %arg3: memref<1x64xf32, #tpu.memory_space<vmem>>, %arg4: memref<64x64xf32, #tpu.memory_space<vmem>>, %arg5: memref<89x64xbf16, #tpu.memory_space<vmem>>) attributes {dimension_semantics = [#tpu.dimension_semantics<parallel>], iteration_bounds = array<i64: 2>, scalar_prefetch = 0 : i64, scratch_operands = 1 : i64, tpu.core_type = #tpu.core_type<tc>, window_params = [{transform_indices = @transform_0, window_bounds = array<i64: 64, 64>}, {pipeline_mode = #tpu.pipeline_mode<synchronous>, transform_indices = @transform_1, window_bounds = array<i64: 9, 64, 64>}, {pipeline_mode = #tpu.pipeline_mode<synchronous>, transform_indices = @transform_2, window_bounds = array<i64: 1, 64>}, {transform_indices = @transform_3, window_bounds = array<i64: 64, 64>}]} {
    %0 = tpu.iota {dimensions = array<i32: 0>} : vector<64x1xi32>
    %c8_i32 = arith.constant 8 : i32
    %c0_i32 = arith.constant 0 : i32
    %1 = arith.cmpi eq, %c8_i32, %c0_i32 : i32
    %c1_i32 = arith.constant 1 : i32
    %2 = arith.select %1, %c1_i32, %c8_i32 : i32
    %3 = vector.broadcast %2 : i32 to vector<64x1xi32>
    %4 = arith.remsi %0, %3 : vector<64x1xi32>
    %c0_i32_0 = arith.constant 0 : i32
    %5 = vector.broadcast %c0_i32_0 : i32 to vector<64x1xi32>
    %6 = arith.cmpi ne, %4, %5 : vector<64x1xi32>
    %c0_i32_1 = arith.constant 0 : i32
    %7 = vector.broadcast %c0_i32_1 : i32 to vector<64x1xi32>
    %8 = arith.cmpi slt, %4, %7 : vector<64x1xi32>
    %c0_i32_2 = arith.constant 0 : i32
    %9 = arith.cmpi slt, %2, %c0_i32_2 : i32
    %10 = vector.broadcast %9 : i1 to vector<64x1xi1>
    %11 = vector.broadcast %10 : vector<64x1xi1> to vector<64x1xi1>
    %12 = arith.xori %8, %11 : vector<64x1xi1>
    %13 = arith.andi %12, %6 : vector<64x1xi1>
    %14 = vector.broadcast %2 : i32 to vector<64x1xi32>
    %15 = arith.addi %4, %14 : vector<64x1xi32>
    %16 = arith.select %13, %15, %4 : vector<64x1xi1>, vector<64x1xi32>
    %c-1_i32 = arith.constant -1 : i32
    %17 = vector.broadcast %c-1_i32 : i32 to vector<64x1xi32>
    %18 = arith.addi %16, %17 : vector<64x1xi32>
    %c0_i32_3 = arith.constant 0 : i32
    %19 = vector.broadcast %c0_i32_3 : i32 to vector<64x1xi32>
    %20 = arith.cmpi sge, %18, %19 : vector<64x1xi32>
    %c-1_i32_4 = arith.constant -1 : i32
    %21 = vector.broadcast %c-1_i32_4 : i32 to vector<64x1xi32>
    %22 = arith.addi %16, %21 : vector<64x1xi32>
    %c8_i32_5 = arith.constant 8 : i32
    %23 = vector.broadcast %c8_i32_5 : i32 to vector<64x1xi32>
    %24 = arith.cmpi slt, %22, %23 : vector<64x1xi32>
    %25 = arith.andi %20, %24 : vector<64x1xi1>
    %c1_i32_6 = arith.constant 1 : i32
    %26 = vector.broadcast %c1_i32_6 : i32 to vector<64x1xi32>
    %27 = arith.addi %16, %26 : vector<64x1xi32>
    %c0_i32_7 = arith.constant 0 : i32
    %28 = vector.broadcast %c0_i32_7 : i32 to vector<64x1xi32>
    %29 = arith.cmpi sge, %27, %28 : vector<64x1xi32>
    %c1_i32_8 = arith.constant 1 : i32
    %30 = vector.broadcast %c1_i32_8 : i32 to vector<64x1xi32>
    %31 = arith.addi %16, %30 : vector<64x1xi32>
    %c8_i32_9 = arith.constant 8 : i32
    %32 = vector.broadcast %c8_i32_9 : i32 to vector<64x1xi32>
    %33 = arith.cmpi slt, %31, %32 : vector<64x1xi32>
    %34 = arith.andi %29, %33 : vector<64x1xi1>
    %cst = arith.constant 0.000000e+00 : bf16
    %35 = vector.broadcast %cst : bf16 to vector<89x64xbf16>
    %c0 = arith.constant 0 : index
    %c0_10 = arith.constant 0 : index
    %36 = vector.load %arg5[%c0, %c0_10] : memref<89x64xbf16, #tpu.memory_space<vmem>>, vector<89x64xbf16>
    tpu.vector_store %arg5[%c0, %c0_10], %35 {strides = array<i32>} : memref<89x64xbf16, #tpu.memory_space<vmem>>, vector<89x64xbf16>,
    %c0_11 = arith.constant 0 : index
    %c0_12 = arith.constant 0 : index
    %37 = vector.load %arg1[%c0_11, %c0_12] : memref<64x64xbf16, #tpu.memory_space<vmem>>, vector<64x64xbf16>
    %c16 = arith.constant 16 : index
    %c0_13 = arith.constant 0 : index
    %38 = vector.load %arg5[%c16, %c0_13] : memref<89x64xbf16, #tpu.memory_space<vmem>>, vector<64x64xbf16>
    tpu.vector_store %arg5[%c16, %c0_13], %37 {strides = array<i32>} : memref<89x64xbf16, #tpu.memory_space<vmem>>, vector<64x64xbf16>,
    %c7 = arith.constant 7 : index
    %c0_14 = arith.constant 0 : index
    %39 = vector.load %arg5[%c7, %c0_14] : memref<89x64xbf16, #tpu.memory_space<vmem>>, vector<64x64xbf16>
    %cst_15 = arith.constant 0.000000e+00 : bf16
    %40 = vector.broadcast %cst_15 : bf16 to vector<64x64xbf16>
    %41 = vector.shape_cast %25 : vector<64x1xi1> to vector<64x1xi1>
    %42 = vector.broadcast %41 : vector<64x1xi1> to vector<64x64xi1>
    %43 = arith.select %42, %39, %40 : vector<64x64xi1>, vector<64x64xbf16>
    %c0_16 = arith.constant 0 : index
    %c0_17 = arith.constant 0 : index
    %c0_18 = arith.constant 0 : index
    %44 = vector.load %arg2[%c0_16, %c0_17, %c0_18] : memref<9x64x64xbf16, #tpu.memory_space<vmem>>, vector<1x64x64xbf16>
    %45 = vector.shape_cast %44 : vector<1x64x64xbf16> to vector<64x64xbf16>
    %cst_19 = arith.constant dense<0.000000e+00> : vector<64x64xf32>
    %46 = tpu.matmul %43, %45, %cst_19 {dimension_numbers = #tpu.dot_dimension_numbers<[1], [0], [0], [1], [0, 0, 1, 1], [], []>} : vector<64x64xbf16>, vector<64x64xbf16>, vector<64x64xf32> -> vector<64x64xf32>
    %c8 = arith.constant 8 : index
    %c0_20 = arith.constant 0 : index
    %47 = vector.load %arg5[%c8, %c0_20] : memref<89x64xbf16, #tpu.memory_space<vmem>>, vector<64x64xbf16>
    %c1 = arith.constant 1 : index
    %c0_21 = arith.constant 0 : index
    %c0_22 = arith.constant 0 : index
    %48 = vector.load %arg2[%c1, %c0_21, %c0_22] : memref<9x64x64xbf16, #tpu.memory_space<vmem>>, vector<1x64x64xbf16>
    %49 = vector.shape_cast %48 : vector<1x64x64xbf16> to vector<64x64xbf16>
    %cst_23 = arith.constant dense<0.000000e+00> : vector<64x64xf32>
    %50 = tpu.matmul %47, %49, %cst_23 {dimension_numbers = #tpu.dot_dimension_numbers<[1], [0], [0], [1], [0, 0, 1, 1], [], []>} : vector<64x64xbf16>, vector<64x64xbf16>, vector<64x64xf32> -> vector<64x64xf32>
    %51 = arith.addf %46, %50 : vector<64x64xf32>
    %c9 = arith.constant 9 : index
    %c0_24 = arith.constant 0 : index
    %52 = vector.load %arg5[%c9, %c0_24] : memref<89x64xbf16, #tpu.memory_space<vmem>>, vector<64x64xbf16>
    %cst_25 = arith.constant 0.000000e+00 : bf16
    %53 = vector.broadcast %cst_25 : bf16 to vector<64x64xbf16>
    %54 = vector.shape_cast %34 : vector<64x1xi1> to vector<64x1xi1>
    %55 = vector.broadcast %54 : vector<64x1xi1> to vector<64x64xi1>
    %56 = arith.select %55, %52, %53 : vector<64x64xi1>, vector<64x64xbf16>
    %c2 = arith.constant 2 : index
    %c0_26 = arith.constant 0 : index
    %c0_27 = arith.constant 0 : index
    %57 = vector.load %arg2[%c2, %c0_26, %c0_27] : memref<9x64x64xbf16, #tpu.memory_space<vmem>>, vector<1x64x64xbf16>
    %58 = vector.shape_cast %57 : vector<1x64x64xbf16> to vector<64x64xbf16>
    %cst_28 = arith.constant dense<0.000000e+00> : vector<64x64xf32>
    %59 = tpu.matmul %56, %58, %cst_28 {dimension_numbers = #tpu.dot_dimension_numbers<[1], [0], [0], [1], [0, 0, 1, 1], [], []>} : vector<64x64xbf16>, vector<64x64xbf16>, vector<64x64xf32> -> vector<64x64xf32>
    %60 = arith.addf %51, %59 : vector<64x64xf32>
    %c15 = arith.constant 15 : index
    %c0_29 = arith.constant 0 : index
    %61 = vector.load %arg5[%c15, %c0_29] : memref<89x64xbf16, #tpu.memory_space<vmem>>, vector<64x64xbf16>
    %cst_30 = arith.constant 0.000000e+00 : bf16
    %62 = vector.broadcast %cst_30 : bf16 to vector<64x64xbf16>
    %63 = vector.shape_cast %25 : vector<64x1xi1> to vector<64x1xi1>
    %64 = vector.broadcast %63 : vector<64x1xi1> to vector<64x64xi1>
    %65 = arith.select %64, %61, %62 : vector<64x64xi1>, vector<64x64xbf16>
    %c3 = arith.constant 3 : index
    %c0_31 = arith.constant 0 : index
    %c0_32 = arith.constant 0 : index
    %66 = vector.load %arg2[%c3, %c0_31, %c0_32] : memref<9x64x64xbf16, #tpu.memory_space<vmem>>, vector<1x64x64xbf16>
    %67 = vector.shape_cast %66 : vector<1x64x64xbf16> to vector<64x64xbf16>
    %cst_33 = arith.constant dense<0.000000e+00> : vector<64x64xf32>
    %68 = tpu.matmul %65, %67, %cst_33 {dimension_numbers = #tpu.dot_dimension_numbers<[1], [0], [0], [1], [0, 0, 1, 1], [], []>} : vector<64x64xbf16>, vector<64x64xbf16>, vector<64x64xf32> -> vector<64x64xf32>
    %69 = arith.addf %60, %68 : vector<64x64xf32>
    %c16_34 = arith.constant 16 : index
    %c0_35 = arith.constant 0 : index
    %70 = vector.load %arg5[%c16_34, %c0_35] : memref<89x64xbf16, #tpu.memory_space<vmem>>, vector<64x64xbf16>
    %c4 = arith.constant 4 : index
    %c0_36 = arith.constant 0 : index
    %c0_37 = arith.constant 0 : index
    %71 = vector.load %arg2[%c4, %c0_36, %c0_37] : memref<9x64x64xbf16, #tpu.memory_space<vmem>>, vector<1x64x64xbf16>
    %72 = vector.shape_cast %71 : vector<1x64x64xbf16> to vector<64x64xbf16>
    %cst_38 = arith.constant dense<0.000000e+00> : vector<64x64xf32>
    %73 = tpu.matmul %70, %72, %cst_38 {dimension_numbers = #tpu.dot_dimension_numbers<[1], [0], [0], [1], [0, 0, 1, 1], [], []>} : vector<64x64xbf16>, vector<64x64xbf16>, vector<64x64xf32> -> vector<64x64xf32>
    %74 = arith.addf %69, %73 : vector<64x64xf32>
    %c17 = arith.constant 17 : index
    %c0_39 = arith.constant 0 : index
    %75 = vector.load %arg5[%c17, %c0_39] : memref<89x64xbf16, #tpu.memory_space<vmem>>, vector<64x64xbf16>
    %cst_40 = arith.constant 0.000000e+00 : bf16
    %76 = vector.broadcast %cst_40 : bf16 to vector<64x64xbf16>
    %77 = vector.shape_cast %34 : vector<64x1xi1> to vector<64x1xi1>
    %78 = vector.broadcast %77 : vector<64x1xi1> to vector<64x64xi1>
    %79 = arith.select %78, %75, %76 : vector<64x64xi1>, vector<64x64xbf16>
    %c5 = arith.constant 5 : index
    %c0_41 = arith.constant 0 : index
    %c0_42 = arith.constant 0 : index
    %80 = vector.load %arg2[%c5, %c0_41, %c0_42] : memref<9x64x64xbf16, #tpu.memory_space<vmem>>, vector<1x64x64xbf16>
    %81 = vector.shape_cast %80 : vector<1x64x64xbf16> to vector<64x64xbf16>
    %cst_43 = arith.constant dense<0.000000e+00> : vector<64x64xf32>
    %82 = tpu.matmul %79, %81, %cst_43 {dimension_numbers = #tpu.dot_dimension_numbers<[1], [0], [0], [1], [0, 0, 1, 1], [], []>} : vector<64x64xbf16>, vector<64x64xbf16>, vector<64x64xf32> -> vector<64x64xf32>
    %83 = arith.addf %74, %82 : vector<64x64xf32>
    %c23 = arith.constant 23 : index
    %c0_44 = arith.constant 0 : index
    %84 = vector.load %arg5[%c23, %c0_44] : memref<89x64xbf16, #tpu.memory_space<vmem>>, vector<64x64xbf16>
    %cst_45 = arith.constant 0.000000e+00 : bf16
    %85 = vector.broadcast %cst_45 : bf16 to vector<64x64xbf16>
    %86 = vector.shape_cast %25 : vector<64x1xi1> to vector<64x1xi1>
    %87 = vector.broadcast %86 : vector<64x1xi1> to vector<64x64xi1>
    %88 = arith.select %87, %84, %85 : vector<64x64xi1>, vector<64x64xbf16>
    %c6 = arith.constant 6 : index
    %c0_46 = arith.constant 0 : index
    %c0_47 = arith.constant 0 : index
    %89 = vector.load %arg2[%c6, %c0_46, %c0_47] : memref<9x64x64xbf16, #tpu.memory_space<vmem>>, vector<1x64x64xbf16>
    %90 = vector.shape_cast %89 : vector<1x64x64xbf16> to vector<64x64xbf16>
    %cst_48 = arith.constant dense<0.000000e+00> : vector<64x64xf32>
    %91 = tpu.matmul %88, %90, %cst_48 {dimension_numbers = #tpu.dot_dimension_numbers<[1], [0], [0], [1], [0, 0, 1, 1], [], []>} : vector<64x64xbf16>, vector<64x64xbf16>, vector<64x64xf32> -> vector<64x64xf32>
    %92 = arith.addf %83, %91 : vector<64x64xf32>
    %c24 = arith.constant 24 : index
    %c0_49 = arith.constant 0 : index
    %93 = vector.load %arg5[%c24, %c0_49] : memref<89x64xbf16, #tpu.memory_space<vmem>>, vector<64x64xbf16>
    %c7_50 = arith.constant 7 : index
    %c0_51 = arith.constant 0 : index
    %c0_52 = arith.constant 0 : index
    %94 = vector.load %arg2[%c7_50, %c0_51, %c0_52] : memref<9x64x64xbf16, #tpu.memory_space<vmem>>, vector<1x64x64xbf16>
    %95 = vector.shape_cast %94 : vector<1x64x64xbf16> to vector<64x64xbf16>
    %cst_53 = arith.constant dense<0.000000e+00> : vector<64x64xf32>
    %96 = tpu.matmul %93, %95, %cst_53 {dimension_numbers = #tpu.dot_dimension_numbers<[1], [0], [0], [1], [0, 0, 1, 1], [], []>} : vector<64x64xbf16>, vector<64x64xbf16>, vector<64x64xf32> -> vector<64x64xf32>
    %97 = arith.addf %92, %96 : vector<64x64xf32>
    %c25 = arith.constant 25 : index
    %c0_54 = arith.constant 0 : index
    %98 = vector.load %arg5[%c25, %c0_54] : memref<89x64xbf16, #tpu.memory_space<vmem>>, vector<64x64xbf16>
    %cst_55 = arith.constant 0.000000e+00 : bf16
    %99 = vector.broadcast %cst_55 : bf16 to vector<64x64xbf16>
    %100 = vector.shape_cast %34 : vector<64x1xi1> to vector<64x1xi1>
    %101 = vector.broadcast %100 : vector<64x1xi1> to vector<64x64xi1>
    %102 = arith.select %101, %98, %99 : vector<64x64xi1>, vector<64x64xbf16>
    %c8_56 = arith.constant 8 : index
    %c0_57 = arith.constant 0 : index
    %c0_58 = arith.constant 0 : index
    %103 = vector.load %arg2[%c8_56, %c0_57, %c0_58] : memref<9x64x64xbf16, #tpu.memory_space<vmem>>, vector<1x64x64xbf16>
    %104 = vector.shape_cast %103 : vector<1x64x64xbf16> to vector<64x64xbf16>
    %cst_59 = arith.constant dense<0.000000e+00> : vector<64x64xf32>
    %105 = tpu.matmul %102, %104, %cst_59 {dimension_numbers = #tpu.dot_dimension_numbers<[1], [0], [0], [1], [0, 0, 1, 1], [], []>} : vector<64x64xbf16>, vector<64x64xbf16>, vector<64x64xf32> -> vector<64x64xf32>
    %106 = arith.addf %97, %105 : vector<64x64xf32>
    %c0_60 = arith.constant 0 : index
    %c0_61 = arith.constant 0 : index
    %107 = vector.load %arg3[%c0_60, %c0_61] : memref<1x64xf32, #tpu.memory_space<vmem>>, vector<1x64xf32>
    %108 = vector.broadcast %107 : vector<1x64xf32> to vector<64x64xf32>
    %109 = arith.addf %106, %108 : vector<64x64xf32>
    %c0_62 = arith.constant 0 : index
    %c0_63 = arith.constant 0 : index
    %110 = vector.load %arg4[%c0_62, %c0_63] : memref<64x64xf32, #tpu.memory_space<vmem>>, vector<64x64xf32>
    tpu.vector_store %arg4[%c0_62, %c0_63], %109 {strides = array<i32>} : memref<64x64xf32, #tpu.memory_space<vmem>>, vector<64x64xf32>,
    return
  }
  func.func @transform_0(%arg0: i32) -> (i32, i32) {
    %c0_i32 = arith.constant 0 : i32
    %c0_i32_0 = arith.constant 0 : i32
    return %arg0, %c0_i32 : i32, i32
  }
  func.func @transform_1(%arg0: i32) -> (i32, i32, i32) {
    %c0_i32 = arith.constant 0 : i32
    %c0_i32_0 = arith.constant 0 : i32
    %c0_i32_1 = arith.constant 0 : i32
    %c0_i32_2 = arith.constant 0 : i32
    return %c0_i32, %c0_i32_0, %c0_i32_1 : i32, i32, i32
  }
  func.func @transform_2(%arg0: i32) -> (i32, i32) {
    %c0_i32 = arith.constant 0 : i32
    %c0_i32_0 = arith.constant 0 : i32
    %c0_i32_1 = arith.constant 0 : i32
    return %c0_i32, %c0_i32_0 : i32, i32
  }
  func.func @transform_3(%arg0: i32) -> (i32, i32) {
    %c0_i32 = arith.constant 0 : i32
    %c0_i32_0 = arith.constant 0 : i32
    return %arg0, %c0_i32 : i32, i32
  }
}

</mosaic_0001>

<bundles_post_ra>
// kernel: tpu_custom_call.1
= control target key start
LH: loop header
LB: loop body
LE: loop exit
PB: predicated region body
PF: predicated region fallthrough
CT: control target
= control target key end

     0   :  { %8 = vsyncpa [#allocation4], 0  ;;  %s2852_s12 = smov 0   ;;  %s3626_s0 = inlined_call_operand.vmem [shape: bf16[128,64], index: 0, kind: input, shape index: {}]   ;;  %s3627_s1 = inlined_call_operand.hbm [shape: bf16[9,64,64], index: 1, kind: input, shape index: {}]   ;;  %s3628_s2 = inlined_call_operand.vmem [shape: f32[1,64], index: 2, kind: input, shape index: {}]   ;;  %s3629_s3 = inlined_call_operand.vmem [shape: f32[128,64], index: 3, kind: output, shape index: {}]  }
   0x1 LB: > { %s2303_s13 = sadd.s32 4294967295, %s2826_s12   ;;  %p2305_p0 = scmp.ge.s32.totalorder %s2826_s12, 1  ;;  %s2826_s12 = sphi %s2852_s12, %s14_s12  }
   0x2   : > { %p113_p1 = scmp.lt.s32.totalorder %s2826_s12, 3  ;;  %s2828_s14 = smov [#allocation3]  }
   0x3   : > { %s125_s15 = sshll.u32 %s2828_s14, 4  ;;  %p2866_p3 = scmp.eq.s32.totalorder %s2303_s13, 0  ;;  %s126_s15 = int_to_ptr.vmem [resolvable:$true] %s125_s15 }
   0x4   : > { %p2860_p2 = pnand %p2305_p0, %p113_p1  ;;  %s2788_s21 = scalar_lea.hbm %s3627_s1, 4608 }
   0x5   : > { %s3634_s17 = scalar_select %p2866_p3, 1, 0 }
   0x6   : > { %s3633_s16 = scalar_select %p2860_p2, 1, 0 }
   0x7   : > { %p2723_p4 = pneg %p2860_p2  ;;  %p2789_p6 = scmp.ne.s32.totalorder %s3627_s1, %s2788_s21 }
   0x8   : > { %p2795_p10 = scmp.lt.u32.totalorder %s2788_s21, %s3627_s1 }
   0x9   : > { %p2874_p5 = pnand %p2866_p3, %p2723_p4 }
   0xb   : > { %p2790_p7 = pneg %p2874_p5 }
   0xd   : > { %p2791_p8 = pnand %p2790_p7, %p2789_p6 }
   0xf   : > { %p2792_p9 = pneg %p2791_p8 }
  0x11   : > { %p2797_p11 = pnand %p2795_p10, %p2792_p9 }
  0x13   : > { %2800 = shalt.err (!%p2797_p11)
}
  0x14   : > { %s2801_s26 = scalar_lea.vmem %s126_s15, 4608  ;;  %p2809_p1 = scmp.lt.s32.totalorder %s126_s15, %s126_s15 }
  0x15   : > { %p2802_p12 = scmp.ne.s32.totalorder %s126_s15, %s2801_s26  ;;  %p2810_p4 = scmp.lt.s32.totalorder %s2801_s26, %s2801_s26 }
  0x17   : > { %p2804_p13 = pnand %p2802_p12, %p2790_p7  ;;  %p2811_p3 = por %p2810_p4, %p2809_p1 }
  0x19   : > { %p2805_p0 = pneg %p2804_p13 }
  0x1b   : > { %p2812_p2 = pnand %p2811_p3, %p2805_p0 }
  0x1d   : > { %2815 = shalt.err (!%p2812_p2)
}
  0x1e   : > { %s2829_s27 = smov 64   ;;  %s2830_s28 = smov 4  }
  0x1f   : > { %2726 = dma.hbm_to_vmem [thread:$0]  (!%p2874_p5), %s3627_s1, 4608, %s126_s15, [#allocation4], %s2829_s27, %s2829_s27, %s2830_s28  }
  0x20   : > { %p3636_p6 = scmp.ne.s32.totalorder %s3633_s16, 0 }
  0x21   : > { %p3637_p8 = scmp.ne.s32.totalorder (!%p3636_p6), %s3634_s17, 0 }
  0x22   : > { %153 = sbr.rel (%p3636_p6) target bundleno = 398 (0x18e), region = 32 }
  0x29   : > { %2821 = dma.done.wait (%p3637_p8), [#allocation4], 4608  }
  0x2a   : > { %2823 = vsyncadd (%p3637_p8), [#allocation4], 4294962688  ;;  %s2310_s4 = sshll.u32 %s2303_s13, 3  ;;  %v192_v0 = vlaneseq  ;;  %vm361_vm0 = vcmask 519168   ;;  %v2831_v1 = vmov 0   ;;  %v2741_v8 = vld [vmem:[#allocation3 + $0x20] sm:$0xff]  }
  0x2b   : > { %p178_p2 = scmp.lt.s32.totalorder %s2310_s4, 15  ;;  %362 = vst.msk [vmem:[#allocation2] sm:$0xf] %vm361_vm0, %v2831_v1  ;;  %363 = vst.msk [vmem:[#allocation2 + $0x4] sm:$0xf] %vm361_vm0, %v2831_v1  ;;  %v2742_v10 = vld [vmem:[#allocation3 + $0x80] sm:$0xff]   ;;  %2503 = vmatprep.subr.bf16.mxu1 %v2741_v8 }
  0x2c   : > { %364 = vst.msk [vmem:[#allocation2 + $0x8] sm:$0xf] %vm361_vm0, %v2831_v1  ;;  %365 = vst.msk [vmem:[#allocation2 + $0xc] sm:$0xf] %vm361_vm0, %v2831_v1  ;;  %v2924_v2 = vshrl.u32 %v192_v0, 7  ;;  %v2743_v12 = vld [vmem:[#allocation3 + $0x28] sm:$0xff]   ;;  %2567 = vmatprep.subr.bf16.mxu0 %v2742_v10  ;;  %2504 = vmatpush3.bf16.msra.mxu1 %v2741_v8 }
  0x2d   : > { %366 = vst.msk [vmem:[#allocation2 + $0x10] sm:$0xf] %vm361_vm0, %v2831_v1  ;;  %367 = vst.msk [vmem:[#allocation2 + $0x14] sm:$0xf] %vm361_vm0, %v2831_v1  ;;  %s3675_s4 = smov (!%p178_p2, %s2310_s4), 15  ;;  %v2744_v14 = vld [vmem:[#allocation3 + $0x88] sm:$0xff]   ;;  %2568 = vmatpush3.bf16.msra.mxu0 %v2742_v10  ;;  %2505 = vmatprep.subr.bf16.mxu1 %v2743_v12 }
  0x2e   : > { %368 = vst.msk [vmem:[#allocation2 + $0x18] sm:$0xf] %vm361_vm0, %v2831_v1  ;;  %369 = vst.msk [vmem:[#allocation2 + $0x1c] sm:$0xf] %vm361_vm0, %v2831_v1  ;;  %v194_v3 = vadd.s32 8, %v2924_v2  ;;  %v195_v4 = vadd.s32 16, %v2924_v2  ;;  %2569 = vmatprep.subr.bf16.mxu0 %v2744_v14 }
  0x2f   : > { %370 = vst.msk [vmem:[#allocation2 + $0x20] sm:$0xf] %vm361_vm0, %v2831_v1  ;;  %371 = vst.msk [vmem:[#allocation2 + $0x24] sm:$0xf] %vm361_vm0, %v2831_v1  ;;  %v2932_v5 = vadd.s32 24, %v2924_v2  ;;  %v205_v6 = vand.u32 7, %v2924_v2 }
  0x30   : > { %372 = vst.msk [vmem:[#allocation2 + $0x28] sm:$0xf] %vm361_vm0, %v2831_v1  ;;  %s2311_s5 = sshll.u32 %s3675_s4, 2  ;;  %v212_v7 = vand.u32 7, %v194_v3  ;;  %v219_v9 = vand.u32 7, %v195_v4  ;;  %v2745_v16 = vld [vmem:[#allocation3 + $0x30] sm:$0xff]   ;;  %2506 = vmatpush3.bf16.msra.mxu1 %v2743_v12 }
  0x31   : > { %v226_v11 = vand.u32 7, %v2932_v5  ;;  %v297_v13 = vadd.s32 4294967295, %v205_v6  ;;  %v2746_v17 = vld [vmem:[#allocation3 + $0x90] sm:$0xff]   ;;  %s2940_s8 = scalar_lea.vmem %s3626_s0, %s2311_s5  ;;  %vm436_vm1 = vsmask.f32 3328  ;;  %v2747_v20 = vld [vmem:[#allocation3 + $0x38] sm:$0xff]   ;;  %2570 = vmatpush3.bf16.msra.mxu0 %v2744_v14  ;;  %2507 = vmatprep.subr.bf16.mxu1 %v2745_v16 }
  0x32   : > { %v298_v15 = vadd.s32 4294967295, %v212_v7  ;;  %v299_v18 = vadd.s32 4294967295, %v219_v9  ;;  %v379_v21 = vld [vmem:[%s2940_s8] sm:$0xf]  ;;  %v380_v22 = vld [vmem:[%s2940_s8 + $0x4] sm:$0xf]  ;;  %2571 = vmatprep.subr.bf16.mxu0 %v2746_v17 }
  0x33   : > { %v300_v19 = vadd.s32 4294967295, %v226_v11  ;;  %vm305_vm2 = vcmp.ge.s32.totalorder %v297_v13, 0  ;;  %v381_v23 = vld [vmem:[%s2940_s8 + $0x8] sm:$0xf]  ;;  %v382_v25 = vld [vmem:[%s2940_s8 + $0xc] sm:$0xf] }
  0x34   : > { %vm306_vm3 = vcmp.ge.s32.totalorder %v298_v15, 0  ;;  %v2748_v24 = vld [vmem:[#allocation3 + $0x98] sm:$0xff]   ;;  %vm307_vm4 = vcmp.ge.s32.totalorder %v299_v18, 0  ;;  %v383_v26 = vld [vmem:[%s2940_s8 + $0x10] sm:$0xf]  ;;  %vm597_vm5 = vcmask 523264   ;;  %vm420_vm7 = vmpackc.low %vm305_vm2, %vm305_vm2  ;;  %2508 = vmatpush3.bf16.msra.mxu1 %v2745_v16 }
  0x35   : > { %387 = vst.msk [vmem:[#allocation2 + $0x8] sm:$0xf] %vm361_vm0, %v379_v21  ;;  %388 = vst.msk [vmem:[#allocation2 + $0xc] sm:$0xf] %vm361_vm0, %v380_v22  ;;  %vm308_vm6 = vcmp.ge.s32.totalorder %v300_v19, 0  ;;  %vm373_vm9 = vcmask 516096   ;;  %2572 = vmatpush3.bf16.msra.mxu0 %v2746_v17  ;;  %2509 = vmatprep.subr.bf16.mxu1 %v2747_v20 }
  0x36   : > { %389 = vst.msk [vmem:[#allocation2 + $0x10] sm:$0xf] %vm361_vm0, %v381_v23  ;;  %390 = vst.msk [vmem:[#allocation2 + $0x14] sm:$0xf] %vm361_vm0, %v382_v25  ;;  %vm437_vm8 = vsmask.f32 7440  ;;  %2573 = vmatprep.subr.bf16.mxu0 %v2748_v24 }
  0x37   : > { %391 = vst.msk [vmem:[#allocation2 + $0x18] sm:$0xf] %vm361_vm0, %v383_v26  ;;  %vm374_vm10 = vsmask.f32 256  ;;  %vm421_vm11 = vmpackc.low %vm306_vm3, %vm306_vm3  ;;  %v428_v27 = vsel %vm420_vm7, 65537, %v2831_v1  ;;  %v329_v28 = vadd.s32 1, %v205_v6 }
  0x38   : > { %v2957_v29 = vadd.s32 1, %v212_v7  ;;  %v2960_v30 = vadd.s32 32, %v2924_v2  ;;  %vm422_vm12 = vmpackc.low %vm307_vm4, %vm307_vm4  ;;  %v429_v31 = vsel %vm421_vm11, 65537, %v2831_v1  ;;  %v440_v32 = vshll.u32 %v428_v27, 16  ;;  %v2965_v35 = vld [vmem:[#allocation2 + $0x4] sm:$0xf]  ;;  %2510 = vmatpush3.bf16.msra.mxu1 %v2747_v20 }
  0x39   : > { %v443_v33 = vshrl.u32 %v428_v27, 16  ;;  %v331_v34 = vadd.s32 1, %v219_v9  ;;  %vm423_vm13 = vmpackc.low %vm308_vm6, %vm308_vm6  ;;  %v430_v36 = vsel %vm422_vm12, 65537, %v2831_v1  ;;  %v449_v37 = vshll.u32 %v429_v31, 16  ;;  %v395_v40 = vld [vmem:[#allocation2] sm:$0x8]  ;;  %2574 = vmatpush3.bf16.msra.mxu0 %v2748_v24 }
  0x3a   : > { %v453_v38 = vshrl.u32 %v429_v31, 16  ;;  %v332_v39 = vadd.s32 1, %v226_v11  ;;  %v431_v41 = vsel %vm423_vm13, 65537, %v2831_v1  ;;  %v2971_v42 = vrot.slane %v440_v32, 5  ;;  %v2973_v49 = vld [vmem:[#allocation3] sm:$0xff]   ;;  %vm2979_vm14 = vmor %vm436_vm1, %vm437_vm8  ;;  %s2313_s9 = sshll.u32 %s3675_s4, 3 }
  0x3b   : > { %v445_v43 = vrot.slane %v443_v33, 4  ;;  %v459_v44 = vshll.u32 %v430_v36, 16  ;;  %v451_v45 = vrot.slane %v449_v37, 5  ;;  %v463_v47 = vshrl.u32 %v430_v36, 16  ;;  %v2975_v50 = vld [vmem:[#allocation3 + $0xa0] sm:$0xff]   ;;  %vm2987_vm3 = vmand %vm373_vm9, %vm374_vm10  ;;  %2519 = vmatprep.subr.bf16.mxu1 %v2973_v49  ;;  %s187_s15 = scalar_lea.vmem %s3629_s3, %s2313_s9 }
  0x3c   : > { %v455_v46 = vrot.slane %v453_v38, 4  ;;  %v469_v48 = vshll.u32 %v431_v41, 16  ;;  %v397_v51 = vld [vmem:[#allocation2 + $0x8] sm:$0xf]  ;;  %v473_v55 = vshrl.u32 %v431_v41, 16  ;;  %vm345_vm15 = vcmp.lt.s32.totalorder %v329_v28, 8  ;;  %2583 = vmatprep.subr.bf16.mxu0 %v2975_v50 }
  0x3d   : > { %v446_v53 = vor.u32 %v445_v43, %v2971_v42  ;;  %v461_v54 = vrot.slane %v459_v44, 5  ;;  %v465_v57 = vrot.slane %v463_v47, 4  ;;  %vm518_vm2 = vcmp.ne.s16.totalorder %v2971_v42, 0  ;;  %v376_v60 = vld [vmem:[#allocation2 + $0x2c] sm:$0x1]  ;;  %vm3004_vm7 = vmpackc.low %vm345_vm15, %vm345_vm15 }
  0x3e   : > { %v456_v56 = vor.u32 %v455_v46, %v451_v45  ;;  %v471_v58 = vrot.slane %v469_v48, 5  ;;  %v475_v62 = vrot.slane %v473_v55, 4  ;;  %v2314_v63 = vcombine.low %v2965_v35, %v397_v51  ;;  %v1683_v12 = vld [vmem:[#allocation2 + $0x8] sm:$0x8]  ;;  %v3043_v20 = vld [vmem:[#allocation2 + $0xc] sm:$0xf] }
  0x3f   : > { %v447_v61 = vrot.slane %v446_v53, 4  ;;  %vm346_vm1 = vcmp.lt.s32.totalorder %v2957_v29, 8  ;;  %v466_v3 = vor.u32 %v465_v57, %v461_v54  ;;  %v527_v4 = vsel %vm518_vm2, %v395_v40, 0  ;;  %v3062_v27 = vld [vmem:[#allocation2 + $0xc] sm:$0xf] }
  0x40   : > { %v457_v0 = vrot.slane %v456_v56, 4  ;;  %vm347_vm4 = vcmp.lt.s32.totalorder %v331_v34, 8  ;;  %v476_v6 = vor.u32 %v475_v62, %v471_v58  ;;  %2511 = vmatprep.mubr.msk.bf16.mxu1 %vm597_vm5, %v2314_v63  ;;  %vm348_vm6 = vcmp.lt.s32.totalorder %v332_v39, 8  ;;  %vm3017_vm11 = vmpackc.low %vm346_vm1, %vm346_vm1  ;;  %v3074_v34 = vld [vmem:[#allocation2 + $0x10] sm:$0xf] }
  0x41   : > { %v452_v5 = vsel %vm2979_vm14, %v447_v61, %v451_v45  ;;  %v377_v7 = vsel %vm2987_vm3, 0, %v376_v60  ;;  %vm885_vm8 = vsmask.f32 4368  ;;  %v467_v10 = vrot.slane %v466_v3, 4  ;;  %vm3033_vm13 = vmpackc.low %vm347_vm4, %vm347_vm4  ;;  %v3081_v37 = vld [vmem:[#allocation2 + $0x14] sm:$0xf] }
  0x42   : > { %v462_v9 = vsel %vm2979_vm14, %v457_v0, %v461_v54  ;;  %vm3010_vm9 = vcmp.ne.s16.totalorder %v452_v5, 0  ;;  %378 = vst [vmem:[#allocation2 + $0x2c] sm:$0x1] %v377_v7  ;;  %v3022_v14 = vadd.s32 40, %v2924_v2  ;;  %v3038_v18 = vadd.s32 48, %v2924_v2  ;;  %vm3051_vm15 = vmpackc.low %vm348_vm6, %vm348_vm6 }
  0x43   : > { %vm3024_vm12 = vcmp.ne.s16.totalorder %v462_v9, 0  ;;  %v528_v16 = vsel %vm3010_vm9, %v2965_v35, 0  ;;  %v3041_v19 = vadd.s32 56, %v2924_v2  ;;  %v472_v21 = vsel %vm2979_vm14, %v467_v10, %v471_v58  ;;  %v1154_v46 = vld [vmem:[#allocation2 + $0x4] sm:$0x8]  ;;  %vm3108_vm1 = vmor %vm374_vm10, %vm885_vm8 }
  0x44   : > { %v529_v22 = vsel %vm3024_vm12, %v397_v51, 0  ;;  %v2326_v23 = vcombine.low %v527_v4, %v528_v16  ;;  %v233_v25 = vand.u32 7, %v2960_v30  ;;  %v3056_v26 = vrot.slane %v476_v6, 4  ;;  %v844_v54 = vld [vmem:[#allocation2 + $0x4] sm:$0xf] }
  0x45   : > { %vm3058_vm3 = vcmp.ne.s16.totalorder %v472_v21, 0  ;;  %v3066_v28 = vsel %vm518_vm2, %v1683_v12, 0  ;;  %v877_v29 = vsel %vm3004_vm7, 65537, %v2831_v1  ;;  %v878_v35 = vsel %vm3017_vm11, 65537, %v2831_v1  ;;  %v3102_v55 = vld [vmem:[#allocation2 + $0x8] sm:$0xf] }
  0x46   : > { %v530_v31 = vsel %vm3058_vm3, %v3043_v20, 0  ;;  %v700_v32 = vshrl.u32 %v2326_v23, 16  ;;  %v703_v33 = vshll.u32 %v2326_v23, 16  ;;  %v1686_v38 = vsel %vm3010_vm9, %v3062_v27, 0  ;;  %v846_v0 = vld [vmem:[#allocation2 + $0xc] sm:$0xf] }
  0x47   : > { %v3079_v36 = vcombine.low %v529_v22, %v530_v31  ;;  %v879_v39 = vsel %vm3033_vm13, 65537, %v2831_v1  ;;  %v880_v40 = vsel %vm3051_vm15, 65537, %v2831_v1  ;;  %v1687_v41 = vsel %vm3024_vm12, %v3074_v34, 0  ;;  %v3121_v13 = vld [vmem:[#allocation2 + $0x10] sm:$0xf] }
  0x48   : > { %v1688_v43 = vsel %vm3058_vm3, %v3081_v37, 0  ;;  %v888_v44 = vshrl.u32 %v877_v29, 16  ;;  %v891_v45 = vshll.u32 %v877_v29, 16  ;;  %v3098_v47 = vrot.slane %v700_v32, 3  ;;  %v384_v22 = vld [vmem:[%s2940_s8 + $0x14] sm:$0xf] }
  0x49   : > { %v3100_v48 = vrot.slane %v703_v33, 4  ;;  %v896_v51 = vshrl.u32 %v878_v35, 16  ;;  %v899_v53 = vshll.u32 %v878_v35, 16  ;;  %v905_v57 = vshrl.u32 %v879_v39, 16  ;;  %392 = vst.msk [vmem:[#allocation2 + $0x1c] sm:$0xf] %vm361_vm0, %v384_v22 }
  0x4a   : > { %v890_v56 = vrot.slane %v888_v44, 7  ;;  %v908_v58 = vshll.u32 %v879_v39, 16  ;;  %v914_v59 = vshrl.u32 %v880_v40, 16  ;;  %v708_v60 = vshrl.u32 %v3079_v36, 16  ;;  %v385_v35 = vld [vmem:[%s2940_s8 + $0x18] sm:$0xf] }
  0x4b   : > { %v711_v61 = vshll.u32 %v3079_v36, 16  ;;  %v898_v62 = vrot.slane %v896_v51, 7  ;;  %v917_v63 = vshll.u32 %v880_v40, 16  ;;  %v907_v6 = vrot.slane %v905_v57, 7  ;;  %393 = vst.msk [vmem:[#allocation2 + $0x20] sm:$0xf] %vm361_vm0, %v385_v35 }
  0x4c   : > { %v3112_v4 = vor.u32 %v891_v45, %v890_v56  ;;  %v894_v5 = vrot.slane %v890_v56, 4  ;;  %v3114_v7 = vrot.slane %v914_v59, 7  ;;  %v1156_v10 = vsel %vm518_vm2, %v1154_v46, 0  ;;  %v1488_v51 = vld [vmem:[#allocation2 + $0x8] sm:$0xf] }
  0x4d   : > { %v901_v8 = vor.u32 %v899_v53, %v898_v62  ;;  %v903_v9 = vrot.slane %v898_v62, 4  ;;  %v1157_v12 = vsel %vm3010_vm9, %v3102_v55, 0  ;;  %v910_v16 = vor.u32 %v908_v58, %v907_v6  ;;  %v3163_v58 = vld [vmem:[#allocation2 + $0x10] sm:$0xf]  ;;  %v386_v59 = vld [vmem:[%s2940_s8 + $0x1c] sm:$0xf] }
  0x4e   : > { %v912_v17 = vrot.slane %v907_v6, 4  ;;  %v919_v21 = vor.u32 %v917_v63, %v3114_v7  ;;  %vm958_vm10 = vcmp.ne.s16.totalorder %v3112_v4, 0  ;;  %v1158_v24 = vsel %vm3024_vm12, %v846_v0, 0  ;;  %394 = vst.msk [vmem:[#allocation2 + $0x24] sm:$0xf] %vm361_vm0, %v386_v59 }
  0x4f   : > { %v3128_v23 = vsel %vm3108_vm1, %v894_v5, %v901_v8  ;;  %v967_v42 = vsel %vm958_vm10, %v844_v54, 0  ;;  %v1159_v29 = vsel %vm3058_vm3, %v3121_v13, 0  ;;  %v3140_v31 = vsel %vm3108_vm1, %v903_v9, %v910_v16  ;;  %v3172_v8 = vld [vmem:[#allocation2 + $0x14] sm:$0xf]  ;;  %v3177_v9 = vld [vmem:[#allocation2 + $0x18] sm:$0xf] }
  0x50   : > { %v3144_v32 = vsel %vm3108_vm1, %v912_v17, %v919_v21  ;;  %vm959_vm2 = vcmp.ne.s16.totalorder %v3128_v23, 0  ;;  %v2352_v33 = vcombine.low %v1156_v10, %v1157_v12  ;;  %vm960_vm4 = vcmp.ne.s16.totalorder %v3140_v31, 0  ;;  %v3186_v17 = vld [vmem:[#allocation2 + $0x18] sm:$0xf] }
  0x51   : > { %vm961_vm6 = vcmp.ne.s16.totalorder %v3144_v32, 0  ;;  %v968_v36 = vsel %vm959_vm2, %v3102_v55, 0  ;;  %v2353_v39 = vcombine.low %v1158_v24, %v1159_v29  ;;  %v969_v40 = vsel %vm960_vm4, %v846_v0, 0 }
  0x52   : > { %v970_v44 = vsel %vm961_vm6, %v3121_v13, 0  ;;  %v3159_v45 = vcombine.low %v967_v42, %v968_v36  ;;  %v1198_v46 = vshrl.u32 %v2352_v33, 16  ;;  %v3161_v53 = vrot.slane %v708_v60, 3  ;;  %v3175_v60 = vld [vmem:[#allocation2 + $0x14] sm:$0xf]  ;;  %v2755_v36 = vld [vmem:[#allocation3 + $0x8] sm:$0xff]  }
  0x53   : > { %v1201_v54 = vshll.u32 %v2352_v33, 16  ;;  %v1206_v56 = vshrl.u32 %v2353_v39, 16  ;;  %v1209_v57 = vshll.u32 %v2353_v39, 16  ;;  %v3166_v62 = vrot.slane %v711_v61, 4  ;;  %v3198_v42 = vld [vmem:[#allocation2 + $0x1c] sm:$0xf] }
  0x54   : > { %v3168_v63 = vcombine.low %v969_v40, %v970_v44  ;;  %v1012_v5 = vshll.u32 %v3159_v45, 16  ;;  %v2365_v6 = vcombine.low %v3102_v55, %v846_v0  ;;  %v3181_v61 = vrot.slane %v1198_v46, 3  ;;  %v2756_v39 = vld [vmem:[#allocation3 + $0xa8] sm:$0xff]   ;;  %v3224_v30 = vld [vmem:[#allocation2 + $0x20] sm:$0xf] }
  0x55   : > { %v3183_v16 = vrot.slane %v1201_v54, 4  ;;  %v3190_v0 = vrot.slane %v1206_v56, 3  ;;  %v3192_v21 = vrot.slane %v1209_v57, 4  ;;  %v3196_v22 = vsel %vm958_vm10, %v1488_v51, 0  ;;  %v3242_v56 = vld [vmem:[#allocation2 + $0x24] sm:$0xf] }
  0x56   : > { %2575 = vmatprep.mubr.msk.bf16.mxu0 %vm597_vm5, %v2365_v6  ;;  %v3188_v55 = vrot.slane %v1012_v5, 1  ;;  %v3203_v24 = vsel %vm959_vm2, %v3062_v27, 0  ;;  %v301_v29 = vadd.s32 4294967295, %v233_v25  ;;  %v2315_v33 = vcombine.low %v3043_v20, %v3163_v58  ;;  %v3222_v20 = vld [vmem:[#allocation2 + $0x1c] sm:$0xf]  ;;  %v2760_v27 = vld [vmem:[#allocation3 + $0x10] sm:$0xff]  }
  0x57   : > { %v333_v35 = vadd.s32 1, %v233_v25  ;;  %v3216_v40 = vcombine.low %v3066_v28, %v1686_v38  ;;  %v2366_v44 = vcombine.low %v3121_v13, %v3172_v8  ;;  %v240_v46 = vand.u32 7, %v3022_v14  ;;  %v3231_v28 = vld [vmem:[#allocation2 + $0x20] sm:$0xf] }
  0x58   : > { %v247_v51 = vand.u32 7, %v3038_v18  ;;  %vm309_vm0 = vcmp.ge.s32.totalorder %v301_v29, 0  ;;  %2512 = vmatmul.mubr.msk.bf16.vlgmr.msra.gmra.mrb[0].mxu1 %vm597_vm5, %v2315_v33  ;;  %v2316_v11 = vcombine.low %v3175_v60, %v3177_v9  ;;  %v2367_v25 = vcombine.low %v3186_v17, %v3198_v42  ;;  %v2762_v57 = vld [vmem:[#allocation3 + $0xb0] sm:$0xff]  }
  0x59   : > { %vm349_vm7 = vcmp.lt.s32.totalorder %v333_v35, 8  ;;  %v3236_v14 = vsel %vm960_vm4, %v3074_v34, 0  ;;  %vm424_vm8 = vmpackc.low %vm309_vm0, %vm309_vm0  ;;  %2576 = vmatmul.mubr.msk.bf16.vlgmr.msra.gmra.mrb[0].mxu0 %vm597_vm5, %v2366_v44  ;;  %2520 = vmatpush3.bf16.msra.mxu1 %v2973_v49  ;;  %v302_v38 = vadd.s32 4294967295, %v240_v46  ;;  %v334_v54 = vadd.s32 1, %v240_v46 }
  0x5a   : > { %v303_v13 = vadd.s32 4294967295, %v247_v51  ;;  %v3252_v59 = vcombine.low %v1687_v41, %v1688_v43  ;;  %v432_v49 = vsel %vm424_vm8, 65537, %v2831_v1  ;;  %vm873_vm9 = vmpackc.low %vm349_vm7, %vm349_vm7  ;;  %2584 = vmatpush3.bf16.msra.mxu0 %v2975_v50  ;;  %2521 = vmatprep.subr.bf16.mxu1 %v2755_v36  ;;  %v254_v5 = vand.u32 7, %v3041_v19  ;;  %v2763_v50 = vld [vmem:[#allocation3 + $0x18] sm:$0xff]  }
  0x5b   : > { %v2317_v2 = vcombine.low %v3222_v20, %v3224_v30  ;;  %v479_v6 = vshll.u32 %v432_v49, 16  ;;  %v483_v29 = vshrl.u32 %v432_v49, 16  ;;  %v881_v15 = vsel %vm873_vm9, 65537, %v2831_v1  ;;  %2585 = vmatprep.subr.bf16.mxu0 %v2756_v39  ;;  %2515 = vmatprep.mubr.msk.bf16.mxu1 %vm597_vm5, %v2316_v11 }
  0x5c   : > { %vm310_vm11 = vcmp.ge.s32.totalorder %v302_v38, 0  ;;  %v923_v41 = vshrl.u32 %v881_v15, 16  ;;  %v926_v43 = vshll.u32 %v881_v15, 16  ;;  %vm311_vm12 = vcmp.ge.s32.totalorder %v303_v13, 0  ;;  %2579 = vmatprep.mubr.msk.bf16.mxu0 %vm597_vm5, %v2367_v25  ;;  %v2764_v38 = vld [vmem:[#allocation3 + $0xb8] sm:$0xff]  }
  0x5d   : > { %vm425_vm13 = vmpackc.low %vm310_vm11, %vm310_vm11  ;;  %vm350_vm15 = vcmp.lt.s32.totalorder %v334_v54, 8  ;;  %v481_v33 = vrot.slane %v479_v6, 5  ;;  %2522 = vmatpush3.bf16.msra.mxu1 %v2755_v36  ;;  %v485_v44 = vrot.slane %v483_v29, 4  ;;  %v2368_v46 = vcombine.low %v3231_v28, %v3242_v56 }
  0x5e   : > { %vm426_vm3 = vmpackc.low %vm311_vm12, %vm311_vm12  ;;  %v433_v35 = vsel %vm425_vm13, 65537, %v2831_v1  ;;  %v3267_v49 = vrot.slane %v923_v41, 7  ;;  %2586 = vmatpush3.bf16.msra.mxu0 %v2756_v39  ;;  %2523 = vmatprep.subr.bf16.mxu1 %v2760_v27  ;;  %v921_v25 = vrot.slane %v3114_v7, 4  ;;  %v3291_v7 = vcombine.low %v3196_v22, %v3203_v24 }
  0x5f   : > { %v3270_v11 = vsel %vm426_vm3, 65537, %v2831_v1  ;;  %v489_v13 = vshll.u32 %v433_v35, 16  ;;  %v493_v15 = vshrl.u32 %v433_v35, 16  ;;  %v482_v36 = vsel %vm2979_vm14, %v3056_v26, %v481_v33  ;;  %vm3279_vm0 = vmpackc.low %vm350_vm15, %vm350_vm15  ;;  %2587 = vmatprep.subr.bf16.mxu0 %v2762_v57 }
  0x60   : > { %v486_v6 = vor.u32 %v485_v44, %v481_v33  ;;  %v499_v29 = vshll.u32 %v3270_v11, 16  ;;  %vm3283_vm7 = vcmp.ne.s16.totalorder %v482_v36, 0  ;;  %v928_v35 = vor.u32 %v926_v43, %v3267_v49  ;;  %2516 = vmatmul.mubr.msk.bf16.gmra.mrb[4].mxu1 %vm597_vm5, %v2317_v2  ;;  %v3298_v36 = vld [vmem:[#allocation2 + $0x18] sm:$0xf] }
  0x61   : > { %v491_v12 = vrot.slane %v489_v13, 5  ;;  %v495_v26 = vrot.slane %v493_v15, 4  ;;  %v304_v33 = vadd.s32 4294967295, %v254_v5  ;;  %2580 = vmatmul.mubr.msk.bf16.gmra.mrb[4].mxu0 %vm597_vm5, %v2368_v46  ;;  %2524 = vmatpush3.bf16.msra.mxu1 %v2760_v27  ;;  %v706_v44 = vor.u32 %v3100_v48, %v3098_v47  ;;  %v3318_v15 = vld [vmem:[#allocation3 + $0xc0] sm:$0xff]  }
  0x62   : > { %v487_v54 = vrot.slane %v486_v6, 4  ;;  %v531_v2 = vsel %vm3283_vm7, %v3163_v58, 0  ;;  %v503_v22 = vshrl.u32 %v3270_v11, 16  ;;  %v882_v24 = vsel %vm3279_vm0, 65537, %v2831_v1  ;;  %2588 = vmatpush3.bf16.msra.mxu0 %v2762_v57  ;;  %2525 = vmatprep.subr.bf16.mxu1 %v2763_v50  ;;  %v3316_v11 = vld [vmem:[#allocation3 + $0x40] sm:$0xff]  }
  0x63   : > { %v496_v43 = vor.u32 %v495_v26, %v491_v12  ;;  %v1689_v27 = vsel %vm3283_vm7, %v3298_v36, 0  ;;  %v3312_v46 = vsel %vm3108_vm1, %v921_v25, %v928_v35  ;;  %v932_v13 = vshrl.u32 %v882_v24, 16  ;;  %2589 = vmatprep.subr.bf16.mxu0 %v2764_v38  ;;  %v3330_v35 = vld [vmem:[#allocation2 + $0x1c] sm:$0xf] }
  0x64   : > { %v492_v58 = vsel %vm2979_vm14, %v487_v54, %v491_v12  ;;  %vm698_vm8 = vsmask.f32 4352  ;;  %v501_v6 = vrot.slane %v499_v29, 5  ;;  %v935_v26 = vshll.u32 %v882_v24, 16 }
  0x65   : > { %v497_v57 = vrot.slane %v496_v43, 4  ;;  %vm3320_vm9 = vcmp.ne.s16.totalorder %v492_v58, 0  ;;  %v1160_v25 = vsel %vm3283_vm7, %v3172_v8, 0  ;;  %v930_v54 = vrot.slane %v3267_v49, 4  ;;  %2526 = vmatpush3.bf16.msra.mxu1 %v2763_v50 }
  0x66   : > { %v532_v12 = vsel %vm3320_vm9, %v3175_v60, 0  ;;  %v3333_v10 = vrot.slane %v932_v13, 7  ;;  %vm962_vm11 = vcmp.ne.s16.totalorder %v3312_v46, 0  ;;  %v1690_v39 = vsel %vm3320_vm9, %v3330_v35, 0  ;;  %2590 = vmatpush3.bf16.msra.mxu0 %v2764_v38  ;;  %2535 = vmatprep.subr.bf16.mxu1 %v3316_v11  ;;  %v2780_v46 = vld [vmem:[#allocation3 + $0xf8] sm:$0xff]  }
  0x67   : > { %v502_v29 = vsel %vm2979_vm14, %v497_v57, %v501_v6  ;;  %v2328_v43 = vcombine.low %v531_v2, %v532_v12  ;;  %vm312_vm13 = vcmp.ge.s32.totalorder %v304_v33, 0  ;;  %v336_v50 = vadd.s32 1, %v254_v5  ;;  %2599 = vmatprep.subr.bf16.mxu0 %v3318_v15 }
  0x68   : > { %vm3341_vm12 = vcmp.ne.s16.totalorder %v502_v29, 0  ;;  %v937_v49 = vor.u32 %v935_v26, %v3333_v10  ;;  %v3353_v2 = vsel %vm962_vm11, %v3172_v8, 0  ;;  %v1161_v58 = vsel %vm3320_vm9, %v3186_v17, 0  ;;  %vm427_vm15 = vmpackc.low %vm312_vm13, %vm312_vm13 }
  0x69   : > { %v717_v38 = vshrl.u32 %v2328_v43, 16  ;;  %v720_v24 = vshll.u32 %v2328_v43, 16  ;;  %v533_v19 = vsel %vm3341_vm12, %v3177_v9, 0  ;;  %v3361_v5 = vcombine.low %v1689_v27, %v1690_v39 }
  0x6a   : > { %v3365_v33 = vsel %vm3108_vm1, %v930_v54, %v937_v49  ;;  %v1162_v8 = vsel %vm3341_vm12, %v3198_v42, 0  ;;  %vm1008_vm3 = vsmask.f32 7424  ;;  %vm352_vm0 = vcmp.lt.s32.totalorder %v336_v50, 8 }
  0x6b   : > { %v719_v13 = vrot.slane %v717_v38, 3  ;;  %v722_v57 = vrot.slane %v720_v24, 4  ;;  %v435_v41 = vsel %vm427_vm15, 65537, %v2831_v1  ;;  %vm963_vm7 = vcmp.ne.s16.totalorder %v3365_v33, 0  ;;  %vm3408_vm9 = vmpackc.low %vm352_vm0, %vm352_vm0 }
  0x6c   : > { %v505_v26 = vrot.slane %v503_v22, 4  ;;  %v509_v9 = vshll.u32 %v435_v41, 16  ;;  %v513_v27 = vshrl.u32 %v435_v41, 16  ;;  %v3372_v12 = vcombine.low %v1160_v25, %v1161_v58 }
  0x6d   : > { %v714_v54 = vor.u32 %v3166_v62, %v3161_v53  ;;  %v1500_v29 = vsel %vm961_vm6, %v3081_v37, 0  ;;  %v1539_v43 = vshrl.u32 %v3291_v7, 16  ;;  %v1541_v25 = vshll.u32 %v3291_v7, 16 }
  0x6e   : > { %v506_v39 = vor.u32 %v505_v26, %v501_v6  ;;  %v511_v49 = vrot.slane %v509_v9, 5  ;;  %v515_v38 = vrot.slane %v513_v27, 4  ;;  %v2378_v24 = vcombine.low %v3236_v14, %v1500_v29  ;;  %v2767_v14 = vld [vmem:[#allocation3 + $0x48] sm:$0xff]   ;;  %v3441_v27 = vld [vmem:[#allocation2 + $0x20] sm:$0xf] }
  0x6f   : > { %v715_v22 = vsel %vm698_vm8, %v706_v44, %v714_v54  ;;  %v3386_v58 = vor.u32 %v722_v57, %v719_v13  ;;  %v1501_v37 = vsel %vm962_vm11, %v3298_v36, 0  ;;  %v1543_v26 = vrot.slane %v1541_v25, 1 }
  0x70   : > { %v507_v53 = vrot.slane %v506_v39, 4  ;;  %v516_v62 = vor.u32 %v515_v38, %v511_v49  ;;  %2527 = vmatprep.mubr.msk.bf16.mxu1 %vm597_vm5, %v715_v22  ;;  %v1546_v6 = vshll.u32 %v2378_v24, 16  ;;  %v1550_v41 = vshrl.u32 %v2378_v24, 16 }
  0x71   : > { %v724_v47 = vsel %vm698_vm8, %v714_v54, %v3386_v58  ;;  %v1502_v48 = vsel %vm963_vm7, %v3330_v35, 0  ;;  %v335_v7 = vadd.s32 1, %v247_v51  ;;  %v1215_v54 = vshrl.u32 %v3372_v12, 16  ;;  %v2769_v51 = vld [vmem:[#allocation3 + $0x50] sm:$0xff]  }
  0x72   : > { %v512_v44 = vsel %vm2979_vm14, %v507_v53, %v511_v49  ;;  %v3401_v13 = vrot.slane %v516_v62, 4  ;;  %v1548_v57 = vrot.slane %v1546_v6, 1  ;;  %2528 = vmatmul.mubr.msk.bf16.vlgmr.msra.gmra.mrb[0].mxu1 %vm597_vm5, %v724_v47  ;;  %v3404_v9 = vcombine.low %v1501_v37, %v1502_v48  ;;  %v2768_v37 = vld [vmem:[#allocation3 + $0xc8] sm:$0xff]   ;;  %v2771_v62 = vld [vmem:[#allocation3 + $0x58] sm:$0xff]  }
  0x73   : > { %vm3413_vm13 = vcmp.ne.s16.totalorder %v512_v44, 0  ;;  %v1544_v52 = vor.u32 %v1543_v26, %v1539_v43  ;;  %2536 = vmatpush3.bf16.msra.mxu1 %v3316_v11  ;;  %vm351_vm14 = vcmp.lt.s32.totalorder %v335_v7, 8  ;;  %v972_v50 = vsel %vm963_vm7, %v3186_v17, 0 }
  0x74   : > { %v1218_v29 = vshll.u32 %v3372_v12, 16  ;;  %vm526_vm15 = vcmp.ne.s16.totalorder %v3401_v13, 0  ;;  %v534_v39 = vsel %vm3413_vm13, %v3222_v20, 0  ;;  %2537 = vmatprep.subr.bf16.mxu1 %v2767_v14  ;;  %vm875_vm0 = vmpackc.low %vm351_vm14, %vm351_vm14  ;;  %v884_v17 = vsel %vm3408_vm9, 65537, %v2831_v1 }
  0x75   : > { %v535_v11 = vsel %vm526_vm15, %v3224_v30, 0  ;;  %v2329_v43 = vcombine.low %v533_v19, %v534_v39  ;;  %v1549_v49 = vsel %vm1008_vm3, %v1544_v52, %v1548_v57  ;;  %v1552_v24 = vor.u32 %v1550_v41, %v1548_v57 }
  0x76   : > { %v2330_v38 = vcombine.low %v535_v11, %v535_v11  ;;  %2591 = vmatprep.mubr.msk.bf16.mxu0 %vm597_vm5, %v1549_v49  ;;  %v1554_v22 = vshll.u32 %v3404_v9, 16  ;;  %v883_v20 = vsel %vm875_vm0, 65537, %v2831_v1  ;;  %v3437_v25 = vcombine.low %v3353_v2, %v972_v50  ;;  %v1496_v50 = vld [vmem:[#allocation2 + $0x28] sm:$0x1]  ;;  %v3444_v49 = vld [vmem:[#allocation2 + $0x24] sm:$0xf] }
  0x77   : > { %2538 = vmatpush3.bf16.msra.mxu1 %v2767_v14  ;;  %v726_v30 = vshrl.u32 %v2329_v43, 16  ;;  %v729_v19 = vshll.u32 %v2329_v43, 16  ;;  %v941_v53 = vshrl.u32 %v883_v20, 16  ;;  %v944_v26 = vshll.u32 %v883_v20, 16 }
  0x78   : > { %v1556_v6 = vrot.slane %v1554_v22, 1  ;;  %v950_v47 = vshrl.u32 %v884_v17, 16  ;;  %v953_v48 = vshll.u32 %v884_v17, 16  ;;  %2539 = vmatprep.subr.bf16.mxu1 %v2769_v51  ;;  %v939_v44 = vrot.slane %v3333_v10, 4 }
  0x79   : > { %v728_v41 = vrot.slane %v726_v30, 3  ;;  %v731_v7 = vrot.slane %v729_v19, 4  ;;  %v943_v57 = vrot.slane %v941_v53, 7  ;;  %v735_v14 = vshrl.u32 %v2330_v38, 16  ;;  %v3448_v30 = vld [vmem:[#allocation3 + $0x60] sm:$0xff]   ;;  %v2770_v53 = vld [vmem:[#allocation3 + $0xd0] sm:$0xff]  }
  0x7a   : > { %v1557_v1 = vsel %vm1008_vm3, %v1552_v24, %v1556_v6  ;;  %v952_v2 = vrot.slane %v950_v47, 7  ;;  %v738_v52 = vshll.u32 %v2330_v38, 16  ;;  %v1558_v17 = vshrl.u32 %v3404_v9, 16 }
  0x7b   : > { %2592 = vmatmul.mubr.msk.bf16.vlgmr.msra.gmra.mrb[0].mxu0 %vm597_vm5, %v1557_v1  ;;  %v732_v39 = vor.u32 %v731_v7, %v728_v41  ;;  %v946_v11 = vor.u32 %v944_v26, %v943_v57  ;;  %v948_v43 = vrot.slane %v943_v57, 4  ;;  %2540 = vmatpush3.bf16.msra.mxu1 %v2769_v51  ;;  %v737_v24 = vrot.slane %v735_v14, 3 }
  0x7c   : > { %2600 = vmatpush3.bf16.msra.mxu0 %v3318_v15  ;;  %v955_v10 = vor.u32 %v953_v48, %v952_v2  ;;  %v740_v22 = vrot.slane %v738_v52, 4  ;;  %v957_v20 = vrot.slane %v952_v2, 4  ;;  %2541 = vmatprep.subr.bf16.mxu1 %v2771_v62  ;;  %v3670_v9 = vshrl.u32 %v3159_v45, 16 }
  0x7d   : > { %2601 = vmatprep.subr.bf16.mxu0 %v2768_v37  ;;  %v733_v38 = vsel %vm698_vm8, %v3386_v58, %v732_v39  ;;  %v3454_v19 = vsel %vm3108_vm1, %v939_v44, %v946_v11  ;;  %v1017_v51 = vshll.u32 %v3168_v63, 16  ;;  %v1727_v1 = vshrl.u32 %v3216_v40, 16 }
  0x7e   : > { %v1015_v15 = vor.u32 %v3188_v55, %v3670_v9  ;;  %2531 = vmatprep.mubr.msk.bf16.mxu1 %vm597_vm5, %v733_v38  ;;  %v3463_v26 = vsel %vm3108_vm1, %v948_v43, %v955_v10  ;;  %vm964_vm9 = vcmp.ne.s16.totalorder %v3454_v19, 0  ;;  %v741_v58 = vor.u32 %v740_v22, %v737_v24 }
  0x7f   : > { %vm3466_vm14 = vcmp.ne.s16.totalorder %v957_v20, 0  ;;  %vm965_vm0 = vcmp.ne.s16.totalorder %v3463_v26, 0  ;;  %v1503_v45 = vsel %vm964_vm9, %v3441_v27, 0  ;;  %v1560_v55 = vor.u32 %v1558_v17, %v1556_v6  ;;  %2542 = vmatpush3.bf16.msra.mxu1 %v2771_v62  ;;  %v2772_v6 = vld [vmem:[#allocation3 + $0xd8] sm:$0xff]  }
  0x80   : > { %v1505_v48 = vsel %vm3466_vm14, %v1496_v50, 0  ;;  %2602 = vmatpush3.bf16.msra.mxu0 %v2768_v37  ;;  %v1504_v3 = vsel %vm965_vm0, %v3444_v49, 0  ;;  %v742_v41 = vsel %vm698_vm8, %v732_v39, %v741_v58  ;;  %v1019_v44 = vrot.slane %v1017_v51, 1  ;;  %2551 = vmatprep.subr.bf16.mxu1 %v3448_v30 }
  0x81   : > { %v2381_v7 = vcombine.low %v1505_v48, %v1505_v48  ;;  %v2380_v57 = vcombine.low %v1503_v45, %v1504_v3  ;;  %2532 = vmatmul.mubr.msk.bf16.gmra.mrb[4].mxu1 %vm597_vm5, %v742_v41  ;;  %2603 = vmatprep.subr.bf16.mxu0 %v2770_v53  ;;  %v1730_v62 = vshll.u32 %v3216_v40, 16  ;;  %v1735_v37 = vshrl.u32 %v3252_v59, 16 }
  0x82   : > { %v1020_v14 = vsel %vm1008_vm3, %v1015_v15, %v1019_v44  ;;  %v3673_v52 = vshrl.u32 %v3168_v63, 16  ;;  %v1738_v39 = vshll.u32 %v3252_v59, 16  ;;  %v1729_v17 = vrot.slane %v1727_v1, 3  ;;  %v3493_v59 = vld [vmem:[#allocation3 + $0xe0] sm:$0xff]  }
  0x83   : > { %v1570_v2 = vshll.u32 %v2381_v7, 16  ;;  %v1562_v11 = vshll.u32 %v2380_v57, 16  ;;  %v1566_v43 = vshrl.u32 %v2380_v57, 16  ;;  %2543 = vmatprep.mubr.msk.bf16.mxu1 %vm597_vm5, %v1020_v14  ;;  %v1732_v10 = vrot.slane %v1730_v62, 4  ;;  %v852_v57 = vld [vmem:[#allocation2 + $0x24] sm:$0x1] }
  0x84   : > { %v1023_v50 = vor.u32 %v3673_v52, %v1019_v44  ;;  %2604 = vmatpush3.bf16.msra.mxu0 %v2770_v53  ;;  %v1737_v22 = vrot.slane %v1735_v37, 3  ;;  %v1740_v40 = vrot.slane %v1738_v39, 4  ;;  %v1025_v20 = vshll.u32 %v3437_v25, 16  ;;  %v2775_v44 = vld [vmem:[#allocation3 + $0x68] sm:$0xff]  }
  0x85   : > { %v1572_v24 = vrot.slane %v1570_v2, 1  ;;  %v1564_v38 = vrot.slane %v1562_v11, 1  ;;  %2605 = vmatprep.subr.bf16.mxu0 %v2772_v6  ;;  %v1733_v9 = vor.u32 %v1732_v10, %v1729_v17  ;;  %v1744_v63 = vshrl.u32 %v3361_v5, 16  ;;  %v3506_v2 = vld [vmem:[#allocation2 + $0x28] sm:$0xf]  ;;  %v2777_v10 = vld [vmem:[#allocation3 + $0x70] sm:$0xff]  }
  0x86   : > { %v1747_v15 = vshll.u32 %v3361_v5, 16  ;;  %v1741_v51 = vor.u32 %v1740_v40, %v1737_v22  ;;  %v1027_v58 = vrot.slane %v1025_v20, 1  ;;  %v973_v45 = vsel %vm964_vm9, %v3198_v42, 0 }
  0x87   : > { %v974_v53 = vsel %vm965_vm0, %v3231_v28, 0  ;;  %v1565_v48 = vsel %vm1008_vm3, %v1560_v55, %v1564_v38  ;;  %v1568_v3 = vor.u32 %v1566_v43, %v1564_v38  ;;  %v1746_v41 = vrot.slane %v1744_v63, 3 }
  0x88   : > { %v1749_v7 = vrot.slane %v1747_v15, 4  ;;  %2595 = vmatprep.mubr.msk.bf16.mxu0 %vm597_vm5, %v1565_v48  ;;  %2606 = vmatpush3.bf16.msra.mxu0 %v2772_v6  ;;  %v1742_v5 = vsel %vm698_vm8, %v1733_v9, %v1741_v51  ;;  %v1028_v1 = vsel %vm1008_vm3, %v1023_v50, %v1027_v58  ;;  %v2342_v62 = vcombine.low %v973_v45, %v974_v53 }
  0x89   : > { %v1029_v37 = vshrl.u32 %v3437_v25, 16  ;;  %v1163_v55 = vsel %vm3413_vm13, %v3231_v28, 0  ;;  %v1573_v14 = vsel %vm1008_vm3, %v1568_v3, %v1572_v24  ;;  %2544 = vmatmul.mubr.msk.bf16.vlgmr.msra.gmra.mrb[0].mxu1 %vm597_vm5, %v1028_v1  ;;  %2615 = vmatprep.subr.bf16.mxu0 %v3493_v59  ;;  %v1691_v6 = vsel %vm3341_vm12, %v3441_v27, 0  ;;  %v2017_v1 = vld [vmem:[#allocation2 + $0xc] sm:$0xf] }
  0x8a   : > { %v1692_v25 = vsel %vm3413_vm13, %v3444_v49, 0  ;;  %2596 = vmatmul.mubr.msk.bf16.gmra.mrb[4].mxu0 %vm597_vm5, %v1573_v14  ;;  %2552 = vmatpush3.bf16.msra.mxu1 %v3448_v30  ;;  %v1033_v28 = vshll.u32 %v2342_v62, 16  ;;  %v975_v39 = vsel %vm3466_vm14, %v852_v57, 0  ;;  %v1750_v11 = vor.u32 %v1749_v7, %v1746_v41  ;;  %v2779_v57 = vld [vmem:[#allocation3 + $0x78] sm:$0xff]   ;;  %v2778_v14 = vld [vmem:[#allocation3 + $0xf0] sm:$0xff]  }
  0x8b   : > { %v1031_v52 = vor.u32 %v1029_v37, %v1027_v58  ;;  %v2393_v50 = vcombine.low %v1691_v6, %v1692_v25  ;;  %2607 = vmatprep.mubr.msk.bf16.mxu0 %vm597_vm5, %v1742_v5  ;;  %2553 = vmatprep.subr.bf16.mxu1 %v2775_v44  ;;  %v2343_v43 = vcombine.low %v975_v39, %v975_v39  ;;  %v1037_v17 = vshrl.u32 %v2342_v62, 16  ;;  %v2018_v62 = vld [vmem:[#allocation2 + $0x10] sm:$0xf] }
  0x8c   : > { %v1693_v18 = vsel %vm526_vm15, %v3506_v2, 0  ;;  %v1035_v24 = vrot.slane %v1033_v28, 1  ;;  %v1164_v20 = vsel %vm526_vm15, %v3242_v56, 0  ;;  %v1204_v9 = vor.u32 %v3183_v16, %v3181_v61  ;;  %v2776_v61 = vld [vmem:[#allocation3 + $0xe8] sm:$0xff]   ;;  %v2023_v28 = vld [vmem:[#allocation2 + $0x24] sm:$0xf] }
  0x8d   : > { %v1753_v22 = vshrl.u32 %v2393_v50, 16  ;;  %v1756_v30 = vshll.u32 %v2393_v50, 16  ;;  %v2394_v40 = vcombine.low %v1693_v18, %v1693_v18  ;;  %v1041_v38 = vshll.u32 %v2343_v43, 16 }
  0x8e   : > { %v3535_v63 = vor.u32 %v3192_v21, %v3190_v0  ;;  %2554 = vmatpush3.bf16.msra.mxu1 %v2775_v44  ;;  %v1036_v15 = vsel %vm1008_vm3, %v1031_v52, %v1035_v24  ;;  %v1039_v53 = vor.u32 %v1037_v17, %v1035_v24  ;;  %v1751_v48 = vsel %vm698_vm8, %v1741_v51, %v1750_v11  ;;  %v2024_v17 = vld [vmem:[#allocation2 + $0x28] sm:$0xf] }
  0x8f   : > { %v1755_v58 = vrot.slane %v1753_v22, 3  ;;  %v1758_v45 = vrot.slane %v1756_v30, 4  ;;  %2547 = vmatprep.mubr.msk.bf16.mxu1 %vm597_vm5, %v1036_v15  ;;  %v1043_v13 = vrot.slane %v1041_v38, 1  ;;  %2555 = vmatprep.subr.bf16.mxu1 %v2777_v10  ;;  %v1762_v56 = vshrl.u32 %v2394_v40, 16  ;;  %v2025_v22 = vld [vmem:[#allocation2 + $0x2c] sm:$0x1] }
  0x90   : > { %v1765_v3 = vshll.u32 %v2394_v40, 16  ;;  %v2356_v41 = vcombine.low %v1164_v20, %v1164_v20  ;;  %v1217_v0 = vrot.slane %v1215_v54, 3  ;;  %v2355_v21 = vcombine.low %v1162_v8, %v1163_v55  ;;  %v2019_v54 = vld [vmem:[#allocation2 + $0x14] sm:$0xf]  ;;  %v2022_v55 = vld [vmem:[#allocation2 + $0x20] sm:$0xf] }
  0x91   : > { %v1759_v16 = vor.u32 %v1758_v45, %v1755_v58  ;;  %v1044_v7 = vsel %vm1008_vm3, %v1039_v53, %v1043_v13  ;;  %v1764_v51 = vrot.slane %v1762_v56, 3  ;;  %v1220_v5 = vrot.slane %v1218_v29, 4  ;;  %v2021_v29 = vld [vmem:[#allocation2 + $0x1c] sm:$0xf]  ;;  %v2786_v40 = vld [vmem:[#allocation2 + $0xc] sm:$0xf] }
  0x92   : > { %v1767_v44 = vrot.slane %v1765_v3, 4  ;;  %2608 = vmatmul.mubr.msk.bf16.vlgmr.msra.gmra.mrb[0].mxu0 %vm597_vm5, %v1751_v48  ;;  %2548 = vmatmul.mubr.msk.bf16.gmra.mrb[4].mxu1 %vm597_vm5, %v1044_v7  ;;  %v1213_v42 = vsel %vm698_vm8, %v1204_v9, %v3535_v63  ;;  %v1224_v60 = vshrl.u32 %v2355_v21, 16  ;;  %v1227_v8 = vshll.u32 %v2355_v21, 16  ;;  %v2782_v48 = vld [vmem:[#allocation3 + $0x108] sm:$0xff]   ;;  %v2784_v21 = vld [vmem:[#allocation3 + $0x110] sm:$0xff]  }
  0x93   : > { %v1760_v37 = vsel %vm698_vm8, %v1750_v11, %v1759_v16  ;;  %2616 = vmatpush3.bf16.msra.mxu0 %v3493_v59  ;;  %2556 = vmatpush3.bf16.msra.mxu1 %v2777_v10  ;;  %v1233_v52 = vshrl.u32 %v2356_v41, 16  ;;  %v2026_v50 = vsel %vm958_vm10, %v2017_v1, 0  ;;  %v2027_v39 = vsel %vm959_vm2, %v2018_v62, 0  ;;  %v3561_v11 = vld [vmem:[#allocation3 + $0x100] sm:$0xff]   ;;  %v2020_v10 = vld [vmem:[#allocation2 + $0x18] sm:$0xf] }
  0x94   : > { %2611 = vmatprep.mubr.msk.bf16.mxu0 %vm597_vm5, %v1760_v37  ;;  %v1768_v12 = vor.u32 %v1767_v44, %v1764_v51  ;;  %2617 = vmatprep.subr.bf16.mxu0 %v2776_v61  ;;  %v1226_v6 = vrot.slane %v1224_v60, 3  ;;  %v1229_v25 = vrot.slane %v1227_v8, 4  ;;  %v1221_v59 = vor.u32 %v1220_v5, %v1217_v0 }
  0x95   : > { %2557 = vmatprep.subr.bf16.mxu1 %v2779_v57  ;;  %2559 = vmatprep.mubr.msk.bf16.mxu1 %vm597_vm5, %v1213_v42  ;;  %v1236_v43 = vshll.u32 %v2356_v41, 16  ;;  %v2030_v24 = vsel %vm962_vm11, %v2021_v29, 0  ;;  %v2031_v4 = vsel %vm963_vm7, %v2022_v55, 0  ;;  %v2028_v23 = vsel %vm960_vm4, %v2019_v54, 0 }
  0x96   : > { %v1230_v18 = vor.u32 %v1229_v25, %v1226_v6  ;;  %v1769_v30 = vsel %vm698_vm8, %v1759_v16, %v1768_v12  ;;  %v2403_v20 = vcombine.low %v2786_v40, %v3074_v34  ;;  %v2032_v38 = vsel %vm964_vm9, %v2023_v28, 0  ;;  %v2787_v16 = vld [vmem:[#allocation2 + $0x14] sm:$0xf] }
  0x97   : > { %2618 = vmatpush3.bf16.msra.mxu0 %v2776_v61  ;;  %v2415_v9 = vcombine.low %v2026_v50, %v2027_v39  ;;  %2558 = vmatpush3.bf16.msra.mxu1 %v2779_v57  ;;  %v1235_v15 = vrot.slane %v1233_v52, 3  ;;  %v2033_v33 = vsel %vm965_vm0, %v2024_v17, 0  ;;  %v2417_v31 = vcombine.low %v2030_v24, %v2031_v4  ;;  %v2428_v4 = vld [vmem:[%s3628_s2] ss:$0 sm:$0xff] }
  0x98   : > { %2619 = vmatprep.subr.bf16.mxu0 %v2778_v14  ;;  %v1222_v58 = vsel %vm698_vm8, %v3535_v63, %v1221_v59  ;;  %2647 = vmatprep.subr.bf16.mxu1 %v3561_v11  ;;  %v1238_v45 = vrot.slane %v1236_v43, 4  ;;  %v2029_v34 = vsel %vm961_vm6, %v2020_v10, 0  ;;  %v2418_v19 = vcombine.low %v2032_v38, %v2033_v33 }
  0x99   : > { %v2034_v53 = vsel %vm3466_vm14, %v2025_v22, 0  ;;  %v1231_v26 = vsel %vm698_vm8, %v1221_v59, %v1230_v18  ;;  %v2083_v13 = vshll.u32 %v2417_v31, 16  ;;  %v2087_v56 = vshrl.u32 %v2417_v31, 16 }
  0x9a   : > { %2612 = vmatmul.mubr.msk.bf16.gmra.mrb[4].mxu0 %vm597_vm5, %v1769_v30  ;;  %v2091_v63 = vshll.u32 %v2418_v19, 16  ;;  %2560 = vmatmul.mubr.msk.bf16.vlgmr.msra.gmra.mrb[0].mxu1 %vm597_vm5, %v1222_v58  ;;  %v2416_v32 = vcombine.low %v2028_v23, %v2029_v34  ;;  %v2070_v3 = vshll.u32 %v2415_v9, 16  ;;  %v1239_v47 = vor.u32 %v1238_v45, %v1235_v15 }
  0x9b   : > { %2620 = vmatpush3.bf16.msra.mxu0 %v2778_v14  ;;  %2623 = vmatprep.mubr.msk.bf16.mxu0 %vm597_vm5, %v2403_v20  ;;  %v2085_v41 = vrot.slane %v2083_v13, 1  ;;  %v2419_v61 = vcombine.low %v2034_v53, %v2034_v53  ;;  %v2404_v0 = vcombine.low %v2787_v16, %v3298_v36  ;;  %v2405_v44 = vcombine.low %v3330_v35, %v3441_v27  ;;  %v2785_v36 = vld [vmem:[#allocation3 + $0x118] sm:$0xff]  }
  0x9c   : > { %2621 = vmatprep.subr.bf16.mxu0 %v2780_v46  ;;  %2651 = vmatpush3.bf16.msra.mxu1 %v3561_v11  ;;  %v2093_v51 = vrot.slane %v2091_v63, 1  ;;  %v2068_v57 = vshrl.u32 %v2415_v9, 16  ;;  %v2072_v5 = vrot.slane %v2070_v3, 1  ;;  %v2075_v1 = vshll.u32 %v2416_v32, 16 }
  0x9d   : > { %2563 = vmatprep.mubr.msk.bf16.mxu1 %vm597_vm5, %v1231_v26  ;;  %2648 = vmatprep.subr.bf16.mxu1 %v2782_v48  ;;  %v2089_v7 = vor.u32 %v2087_v56, %v2085_v41  ;;  %v1240_v62 = vsel %vm698_vm8, %v1230_v18, %v1239_v47  ;;  %v2095_v37 = vshrl.u32 %v2418_v19, 16  ;;  %v2099_v42 = vshll.u32 %v2419_v61, 16 }
  0x9e   : > { %v2073_v35 = vor.u32 %v2072_v5, %v2068_v57  ;;  %v2077_v27 = vrot.slane %v2075_v1, 1  ;;  %v2406_v12 = vcombine.low %v3444_v49, %v3506_v2  ;;  %v2079_v29 = vshrl.u32 %v2416_v32, 16 }
  0x9f   : > { %2622 = vmatpush3.bf16.msra.mxu0 %v2780_v46  ;;  %v2094_v60 = vsel %vm1008_vm3, %v2089_v7, %v2093_v51  ;;  %v2097_v8 = vor.u32 %v2095_v37, %v2093_v51  ;;  %v2101_v54 = vrot.slane %v2099_v42, 1 }
  0xa0   : > { %2631 = vmatprep.subr.bf16.mxu0 %v3561_v11  ;;  %2652 = vmatpush3.bf16.msra.mxu1 %v2782_v48  ;;  %v2078_v55 = vsel %vm1008_vm3, %v2073_v35, %v2077_v27  ;;  %v2081_v6 = vor.u32 %v2079_v29, %v2077_v27 }
  0xa1   : > { %2649 = vmatprep.subr.bf16.mxu1 %v2784_v21  ;;  %v2102_v14 = vsel %vm1008_vm3, %v2097_v8, %v2101_v54 }
  0xa2   : > { %2624 = vmatmul.mubr.msk.bf16.vlgmr.msra.gmra.mrb[0].mxu0 %vm597_vm5, %v2404_v0  ;;  %2564 = vmatmul.mubr.msk.bf16.gmra.mrb[4].mxu1 %vm597_vm5, %v1240_v62  ;;  %v2086_v49 = vsel %vm1008_vm3, %v2081_v6, %v2085_v41 }
  0xa3   : > { %2632 = vmatpush3.bf16.msra.mxu0 %v3561_v11  ;;  %2627 = vmatprep.mubr.msk.bf16.mxu0 %vm597_vm5, %v2405_v44 }
  0xa4   : > { %2633 = vmatprep.subr.bf16.mxu0 %v2782_v48  ;;  %2653 = vmatpush3.bf16.msra.mxu1 %v2784_v21 }
  0xa5   : > { %2643 = vmatprep.mubr.msk.bf16.mxu1 %vm597_vm5, %v2094_v60  ;;  %2650 = vmatprep.subr.bf16.mxu1 %v2785_v36 }
  0xa7   : > { %2634 = vmatpush3.bf16.msra.mxu0 %v2782_v48 }
  0xa8   : > { %2635 = vmatprep.subr.bf16.mxu0 %v2784_v21  ;;  %2654 = vmatpush3.bf16.msra.mxu1 %v2785_v36 }
  0xaa   : > { %2628 = vmatmul.mubr.msk.bf16.gmra.mrb[4].mxu0 %vm597_vm5, %v2406_v12 }
  0xab   : > { %2636 = vmatpush3.bf16.msra.mxu0 %v2784_v21  ;;  %2639 = vmatprep.mubr.msk.bf16.mxu0 %vm597_vm5, %v2078_v55 }
  0xac   : > { %2637 = vmatprep.subr.bf16.mxu0 %v2785_v36  ;;  %2644 = vmatmul.mubr.msk.bf16.vlgmr.msra.gmra.mrb[8].mxu1 %vm597_vm5, %v2102_v14 }
  0xaf   : > { %2638 = vmatpush3.bf16.msra.mxu0 %v2785_v36 }
  0xb2   : > { %2640 = vmatmul.mubr.msk.bf16.vlgmr.msra.gmra.mrb[0].mxu0 %vm597_vm5, %v2086_v49 }
 0x16d   : > { %v2561_v2 = vpop.f32.mrb[0].mxu1 }
 0x16e   : > { %v1311_v25 = vpop.f32.mrb[1].mxu1 }
 0x16f   : > { %v2562_v52 = vpop.f32.mrb[2].mxu1 }
 0x170   : > { %v1314_v28 = vpop.f32.mrb[3].mxu1 }
 0x175   : > { %v2565_v50 = vpop.f32.mrb[4].mxu1 }
 0x176   : > { %v1327_v39 = vpop.f32.mrb[5].mxu1 }
 0x177   : > { %v2566_v59 = vpop.f32.mrb[6].mxu1 }
 0x178   : > { %v1330_v11 = vpop.f32.mrb[7].mxu1 }
 0x17d   : > { %v2629_v43 = vpop.f32.mrb[4].mxu0 }
 0x17e   : > { %v2659_v17 = vadd.f32 %v2629_v43, %v2565_v50  ;;  %v1994_v18 = vpop.f32.mrb[5].mxu0 }
 0x17f   : > { %v2661_v10 = vadd.f32 %v1994_v18, %v1327_v39  ;;  %v2630_v24 = vpop.f32.mrb[6].mxu0  ;;  %v2645_v23 = vpop.f32.mrb[8].mxu1 }
 0x180   : > { %v2663_v22 = vadd.f32 %v2630_v24, %v2566_v59  ;;  %v1997_v30 = vpop.f32.mrb[7].mxu0  ;;  %v2660_v40 = vadd.f32 %v2659_v17, %v2645_v23  ;;  %v2189_v20 = vpop.f32.mrb[9].mxu1 }
 0x181   : > { %v2665_v38 = vadd.f32 %v1997_v30, %v1330_v11  ;;  %v2662_v9 = vadd.f32 %v2661_v10, %v2189_v20  ;;  %v2646_v46 = vpop.f32.mrb[10].mxu1 }
 0x182   : > { %v2225_v15 = vadd.f32 %v2660_v40, %v2428_v4  ;;  %v2664_v33 = vadd.f32 %v2663_v22, %v2646_v46  ;;  %v2192_v31 = vpop.f32.mrb[11].mxu1 }
 0x183   : > { %v2223_v58 = vadd.f32 %v2662_v9, %v2428_v4  ;;  %v2666_v45 = vadd.f32 %v2665_v38, %v2192_v31 }
 0x184   : > { %2233 = vst.msk [vmem:[%s187_s15 + $0x30] sm:$0xff] %vm597_vm5, %v2225_v15  ;;  %v2226_v34 = vadd.f32 %v2664_v33, %v2428_v4 }
 0x185   : > { %v2641_v19 = vpop.f32.mrb[0].mxu0  ;;  %2231 = vst.msk [vmem:[%s187_s15 + $0x20] sm:$0xff] %vm597_vm5, %v2223_v58  ;;  %v2224_v53 = vadd.f32 %v2666_v45, %v2428_v4 }
 0x186   : > { %v2655_v48 = vadd.f32 %v2641_v19, %v2561_v2  ;;  %v2173_v26 = vpop.f32.mrb[1].mxu0  ;;  %2234 = vst.msk [vmem:[%s187_s15 + $0x38] sm:$0xff] %vm597_vm5, %v2226_v34 }
 0x187   : > { %v2656_v13 = vadd.f32 %v2173_v26, %v1311_v25  ;;  %v2642_v56 = vpop.f32.mrb[2].mxu0  ;;  %2232 = vst.msk [vmem:[%s187_s15 + $0x28] sm:$0xff] %vm597_vm5, %v2224_v53 }
 0x188   : > { %v2221_v63 = vadd.f32 %v2655_v48, %v2428_v4  ;;  %v2657_v32 = vadd.f32 %v2642_v56, %v2562_v52  ;;  %v2176_v3 = vpop.f32.mrb[3].mxu0 }
 0x189   : > { %v2219_v41 = vadd.f32 %v2656_v13, %v2428_v4  ;;  %v2658_v47 = vadd.f32 %v2176_v3, %v1314_v28 }
 0x18a   : > { %2229 = vst.msk [vmem:[%s187_s15 + $0x10] sm:$0xff] %vm597_vm5, %v2221_v63  ;;  %v2222_v61 = vadd.f32 %v2657_v32, %v2428_v4 }
 0x18b   : > { %2227 = vst.msk [vmem:[%s187_s15] sm:$0xff] %vm597_vm5, %v2219_v41  ;;  %v2220_v16 = vadd.f32 %v2658_v47, %v2428_v4 }
 0x18c   : > { %2230 = vst.msk [vmem:[%s187_s15 + $0x18] sm:$0xff] %vm597_vm5, %v2222_v61 }
 0x18d   : > { %2228 = vst.msk [vmem:[%s187_s15 + $0x8] sm:$0xff] %vm597_vm5, %v2220_v16 }
 0x18e PF: > { %s14_s12 = sadd.s32 1, %s2826_s12  }
 0x18f   : > { %p11_p3 = scmp.ge.s32.totalorder %s14_s12, 4  }
 0x191   :  { %13 = sbr.rel (!%p11_p3) target bundleno = 1 (0x1), region = 75 }
 0x198   :  { %2257 = vsyncpa [#allocation4], 1 }
 0x199   :  { %2259 = vsyncpa [#allocation4 + $0x1], 1 }

</bundles_post_ra>
